<compile_context>
chip_gen: v7x
topology: tpu7x:2x2x1
jax: 0.10.0
libtpu: 0.0.40
codegen_flags: <defaults>
</compile_context>

<pallas_src>
import math

import jax
import jax.numpy as jnp
from jax.experimental import pallas as pl
from jax.experimental.pallas import tpu as pltpu

D_MODEL = 32
NUM_HEADS = 4
DEPTH = D_MODEL // NUM_HEADS
D_FF = 64
SEQ = 8
BATCH = 2
BS = BATCH * SEQ
LN_EPS = 1e-5  # PyTorch nn.LayerNorm default


def _layernorm(x, gamma, beta):
    mean = jnp.mean(x, axis=-1, keepdims=True)
    var = jnp.mean((x - mean) ** 2, axis=-1, keepdims=True)
    return (x - mean) / jnp.sqrt(var + LN_EPS) * gamma + beta


def encoder_layer_kernel(x_ref, wqkv_ref, bqkv_ref, wo_ref, w1_ref, w2_ref,
                         vec_ref, out_ref):
    x = x_ref[...]                                   # (BS, D) = (16, 32)

    # pre-broadcast bias / LayerNorm vectors: (BS, N) rows, no in-kernel broadcasts
    b_o = vec_ref[0, :, :D_MODEL]
    b1  = vec_ref[1]                                  # (BS, D_FF)
    b2  = vec_ref[2, :, :D_MODEL]
    g1  = vec_ref[3, :, :D_MODEL]
    be1 = vec_ref[4, :, :D_MODEL]
    g2  = vec_ref[5, :, :D_MODEL]
    be2 = vec_ref[6, :, :D_MODEL]

    # --- head-batched fused QKV projection -----------------------------------
    # x broadcast over heads: (H, BS, D); per-head fused weights: (H, D, 3*DEPTH)
    x_b = jnp.broadcast_to(x, (NUM_HEADS, BS, D_MODEL))
    qkv = jnp.einsum("hbd,hde->hbe", x_b, wqkv_ref[...],
                     preferred_element_type=jnp.float32) + bqkv_ref[...]
    # qkv: (H, BS, 3*DEPTH); lanes [0:8)=Q, [8:16)=K, [16:24)=V per head

    def to_batched(t):  # (H, BS, DEPTH) -> (H*B, S, DEPTH), sublane-tile aligned
        return t.reshape(NUM_HEADS, BATCH, SEQ, DEPTH).reshape(
            NUM_HEADS * BATCH, SEQ, DEPTH)

    q = to_batched(qkv[:, :, 0:DEPTH])
    k = to_batched(qkv[:, :, DEPTH:2 * DEPTH])
    v = to_batched(qkv[:, :, 2 * DEPTH:3 * DEPTH])

    # --- attention: one scores einsum, one softmax, one ctx einsum -----------
    scale = 1.0 / math.sqrt(float(DEPTH))
    s = jnp.einsum("bqd,bkd->bqk", q, k,
                   preferred_element_type=jnp.float32) * scale     # (H*B, S, S)
    s = s - jnp.max(s, axis=-1, keepdims=True)
    p = jnp.exp(s)
    attn = p / jnp.sum(p, axis=-1, keepdims=True)                   # exact divide
    ctx = jnp.einsum("bqk,bkd->bqd", attn, v,
                     preferred_element_type=jnp.float32)            # (H*B, S, DEPTH)

    # --- output projection: per-head einsum, summed over heads ---------------
    ctx_h = ctx.reshape(NUM_HEADS, BATCH, SEQ, DEPTH).reshape(NUM_HEADS, BS, DEPTH)
    proj = jnp.einsum("hbd,hde->hbe", ctx_h, wo_ref[...],
                      preferred_element_type=jnp.float32)           # (H, BS, D)
    attn_out = (proj[0] + proj[1]) + (proj[2] + proj[3]) + b_o

    # --- residual + LayerNorm1 ------------------------------------------------
    out1 = _layernorm(x + attn_out, g1, be1)

    # --- FFN (Linear -> ReLU -> Linear) + residual + LayerNorm2 ---------------
    h1 = jnp.maximum(
        jnp.dot(out1, w1_ref[...], preferred_element_type=jnp.float32) + b1, 0.0)
    ffn = jnp.dot(h1, w2_ref[...], preferred_element_type=jnp.float32) + b2
    out2 = _layernorm(out1 + ffn, g2, be2)

    out_ref[...] = out2


def transformer_encoder_layer(x, packed_params):
    """x: (B, S, D) f32; packed_params = (wqkv_h, bqkv_h, wo_h, w1, w2, vecs_b)."""
    wqkv_h, bqkv_h, wo_h, w1, w2, vecs_b = packed_params
    B, S, D = x.shape
    assert (B, S, D) == (BATCH, SEQ, D_MODEL)

    x2d = x.reshape(B * S, D)   # pure metadata reshape (row-major contiguous)

    vmem = lambda: pl.BlockSpec(memory_space=pltpu.MemorySpace.VMEM)

    out2d = pl.pallas_call(
        encoder_layer_kernel,
        out_shape=jax.ShapeDtypeStruct((B * S, D), jnp.float32),
        in_specs=[vmem() for _ in range(7)],
        out_specs=vmem(),
    )(x2d, wqkv_h, bqkv_h, wo_h, w1, w2, vecs_b)

    return out2d.reshape(B, S, D)


def init_params(key):
    """Deterministic synthetic parameters. Linear weights stored pre-transposed
    as (in, out) so the math is y = x @ W + b (PyTorch-style uniform init)."""
    keys = jax.random.split(key, 12)

    def lin(kw, kb, fan_in, fan_out):
        bound = 1.0 / math.sqrt(fan_in)
        w = jax.random.uniform(kw, (fan_in, fan_out), jnp.float32, -bound, bound)
        b = jax.random.uniform(kb, (1, fan_out), jnp.float32, -bound, bound)
        return w, b

    wq, bq = lin(keys[0], keys[1], D_MODEL, D_MODEL)
    wk, bk = lin(keys[2], keys[3], D_MODEL, D_MODEL)
    wv, bv = lin(keys[4], keys[5], D_MODEL, D_MODEL)
    wo, bo = lin(keys[6], keys[7], D_MODEL, D_MODEL)
    w1, b1 = lin(keys[8], keys[9], D_MODEL, D_FF)
    w2, b2 = lin(keys[10], keys[11], D_FF, D_MODEL)
    g1 = jnp.ones((1, D_MODEL), jnp.float32)
    be1 = jnp.zeros((1, D_MODEL), jnp.float32)
    g2 = jnp.ones((1, D_MODEL), jnp.float32)
    be2 = jnp.zeros((1, D_MODEL), jnp.float32)
    return (wq, bq, wk, bk, wv, bv, wo, bo, w1, b1, w2, b2, g1, be1, g2, be2)


def pack_params(params):
    """One-time packing into a head-batched, kernel-friendly layout:
      wqkv_h : (H, D, 3*DEPTH)  per-head fused [Wq_h | Wk_h | Wv_h]
      bqkv_h : (H, BS, 3*DEPTH) per-head fused qkv bias, pre-broadcast over rows
      wo_h   : (H, DEPTH, D)    per-head output projection
      w1, w2 : FFN weights
      vecs_b : (7, BS, D_FF)    all remaining (1,N) vectors pre-broadcast to rows
    """
    (wq, bq, wk, bk, wv, bv, wo, bo, w1, b1, w2, b2, g1, be1, g2, be2) = params

    def head_cols(w):   # (D, D) -> (H, D, DEPTH): split output columns per head
        return w.reshape(D_MODEL, NUM_HEADS, DEPTH).transpose(1, 0, 2)

    def head_vec(b):    # (1, D) -> (H, 1, DEPTH)
        return b.reshape(NUM_HEADS, 1, DEPTH)

    wqkv_h = jnp.concatenate([head_cols(wq), head_cols(wk), head_cols(wv)], axis=2)
    bqkv_h = jnp.concatenate([head_vec(bq), head_vec(bk), head_vec(bv)], axis=2)
    bqkv_h = jnp.broadcast_to(bqkv_h, (NUM_HEADS, BS, 3 * DEPTH)).astype(jnp.float32)
    wo_h = wo.reshape(NUM_HEADS, DEPTH, D_MODEL)

    vecs_b = jnp.zeros((7, BS, D_FF), jnp.float32)
    for i, v in enumerate([bo, b1, b2, g1, be1, g2, be2]):
        n = v.shape[1]
        vecs_b = vecs_b.at[i, :, :n].set(jnp.broadcast_to(v, (BS, n)))

    return wqkv_h, bqkv_h, wo_h, w1, w2, vecs_b


def reference_forward(x, params):
    """Pure-JAX reference matching the PyTorch module's forward (eval mode)."""
    (wq, bq, wk, bk, wv, bv, wo, bo, w1, b1, w2, b2, g1, be1, g2, be2) = params
    B, S, D = x.shape

    def split(t):
        return t.reshape(B, S, NUM_HEADS, DEPTH).transpose(0, 2, 1, 3)

    q = split(x @ wq + bq)
    k = split(x @ wk + bk)
    v = split(x @ wv + bv)
    scores = jnp.einsum("bhqd,bhkd->bhqk", q, k) / math.sqrt(DEPTH)
    attn = jax.nn.softmax(scores, axis=-1)
    ctx = jnp.einsum("bhqk,bhkd->bhqd", attn, v)
    ctx = ctx.transpose(0, 2, 1, 3).reshape(B, S, D)
    attn_out = ctx @ wo + bo

    def ln(t, g, be):
        m = jnp.mean(t, axis=-1, keepdims=True)
        var = jnp.mean((t - m) ** 2, axis=-1, keepdims=True)
        return (t - m) / jnp.sqrt(var + LN_EPS) * g + be

    out1 = ln(x + attn_out, g1, be1)
    ffn = jnp.maximum(out1 @ w1 + b1, 0.0) @ w2 + b2
    return ln(out1 + ffn, g2, be2)


if __name__ == "__main__":
    # Pin matmul precision so the pure-JAX reference and the kernel use the same
    # (accurate) f32 algorithm; DEFAULT precision on TPU would silently use bf16
    # passes in the reference and break the comparison.
    jax.config.update("jax_default_matmul_precision", "highest")

    key = jax.random.PRNGKey(0)
    kx, kp = jax.random.split(key)
    x = jax.random.normal(kx, (BATCH, SEQ, D_MODEL), jnp.float32)
    raw_params = init_params(kp)
    packed = pack_params(raw_params)

    out = transformer_encoder_layer(x, packed)
    out = jax.block_until_ready(out)

    ref = reference_forward(x, raw_params)
    assert out.shape == (BATCH, SEQ, D_MODEL)
    assert jnp.allclose(out, ref, atol=1e-3, rtol=1e-3), "mismatch vs reference"
    print("KERNEL_OK")
</pallas_src>

<mosaic_0001>
module attributes {stable_mosaic.version = 11 : i64} {
  func.func @encoder_layer_kernel(%arg0: memref<16x32xf32, #tpu.memory_space<vmem>>, %arg1: memref<4x32x24xf32, #tpu.memory_space<vmem>>, %arg2: memref<4x16x24xf32, #tpu.memory_space<vmem>>, %arg3: memref<4x8x32xf32, #tpu.memory_space<vmem>>, %arg4: memref<32x64xf32, #tpu.memory_space<vmem>>, %arg5: memref<64x32xf32, #tpu.memory_space<vmem>>, %arg6: memref<7x16x64xf32, #tpu.memory_space<vmem>>, %arg7: memref<16x32xf32, #tpu.memory_space<vmem>>) attributes {dimension_semantics = [], scalar_prefetch = 0 : i64, scratch_operands = 0 : i64, tpu.core_type = #tpu.core_type<tc>} {
    %c0 = arith.constant 0 : index
    %c0_0 = arith.constant 0 : index
    %0 = vector.load %arg0[%c0, %c0_0] : memref<16x32xf32, #tpu.memory_space<vmem>>, vector<16x32xf32>
    %c0_1 = arith.constant 0 : index
    %c0_2 = arith.constant 0 : index
    %c0_3 = arith.constant 0 : index
    %1 = vector.load %arg6[%c0_1, %c0_2, %c0_3] : memref<7x16x64xf32, #tpu.memory_space<vmem>>, vector<1x16x32xf32>
    %2 = vector.shape_cast %1 : vector<1x16x32xf32> to vector<16x32xf32>
    %c1 = arith.constant 1 : index
    %c0_4 = arith.constant 0 : index
    %c0_5 = arith.constant 0 : index
    %3 = vector.load %arg6[%c1, %c0_4, %c0_5] : memref<7x16x64xf32, #tpu.memory_space<vmem>>, vector<1x16x64xf32>
    %4 = vector.shape_cast %3 : vector<1x16x64xf32> to vector<16x64xf32>
    %c2 = arith.constant 2 : index
    %c0_6 = arith.constant 0 : index
    %c0_7 = arith.constant 0 : index
    %5 = vector.load %arg6[%c2, %c0_6, %c0_7] : memref<7x16x64xf32, #tpu.memory_space<vmem>>, vector<1x16x32xf32>
    %6 = vector.shape_cast %5 : vector<1x16x32xf32> to vector<16x32xf32>
    %c3 = arith.constant 3 : index
    %c0_8 = arith.constant 0 : index
    %c0_9 = arith.constant 0 : index
    %7 = vector.load %arg6[%c3, %c0_8, %c0_9] : memref<7x16x64xf32, #tpu.memory_space<vmem>>, vector<1x16x32xf32>
    %8 = vector.shape_cast %7 : vector<1x16x32xf32> to vector<16x32xf32>
    %c4 = arith.constant 4 : index
    %c0_10 = arith.constant 0 : index
    %c0_11 = arith.constant 0 : index
    %9 = vector.load %arg6[%c4, %c0_10, %c0_11] : memref<7x16x64xf32, #tpu.memory_space<vmem>>, vector<1x16x32xf32>
    %10 = vector.shape_cast %9 : vector<1x16x32xf32> to vector<16x32xf32>
    %c5 = arith.constant 5 : index
    %c0_12 = arith.constant 0 : index
    %c0_13 = arith.constant 0 : index
    %11 = vector.load %arg6[%c5, %c0_12, %c0_13] : memref<7x16x64xf32, #tpu.memory_space<vmem>>, vector<1x16x32xf32>
    %12 = vector.shape_cast %11 : vector<1x16x32xf32> to vector<16x32xf32>
    %c6 = arith.constant 6 : index
    %c0_14 = arith.constant 0 : index
    %c0_15 = arith.constant 0 : index
    %13 = vector.load %arg6[%c6, %c0_14, %c0_15] : memref<7x16x64xf32, #tpu.memory_space<vmem>>, vector<1x16x32xf32>
    %14 = vector.shape_cast %13 : vector<1x16x32xf32> to vector<16x32xf32>
    %15 = vector.shape_cast %0 : vector<16x32xf32> to vector<1x16x32xf32>
    %16 = vector.broadcast %15 : vector<1x16x32xf32> to vector<4x16x32xf32>
    %c0_16 = arith.constant 0 : index
    %c0_17 = arith.constant 0 : index
    %c0_18 = arith.constant 0 : index
    %17 = vector.load %arg1[%c0_16, %c0_17, %c0_18] : memref<4x32x24xf32, #tpu.memory_space<vmem>>, vector<4x32x24xf32>
    "tpu.trace_start"() <{level = 10 : i32, message = "hbd,hde->hbe"}> : () -> ()
    %cst = arith.constant dense<0.000000e+00> : vector<4x16x24xf32>
    %18 = tpu.matmul %16, %17, %cst {dimension_numbers = #tpu.dot_dimension_numbers<[2], [1], [1], [2], [0, 0, 0, 1, 1, 2], [0], [0]>, precision = #tpu.contract_precision<fp32>} : vector<4x16x32xf32>, vector<4x32x24xf32>, vector<4x16x24xf32> -> vector<4x16x24xf32>
    "tpu.trace_stop"() : () -> ()
    %c0_19 = arith.constant 0 : index
    %c0_20 = arith.constant 0 : index
    %c0_21 = arith.constant 0 : index
    %19 = vector.load %arg2[%c0_19, %c0_20, %c0_21] : memref<4x16x24xf32, #tpu.memory_space<vmem>>, vector<4x16x24xf32>
    %20 = arith.addf %18, %19 : vector<4x16x24xf32>
    %21 = vector.extract_strided_slice %20 {offsets = [0, 0, 0], sizes = [4, 16, 8], strides = [1, 1, 1]} : vector<4x16x24xf32> to vector<4x16x8xf32>
    %22 = vector.shape_cast %21 : vector<4x16x8xf32> to vector<4x2x8x8xf32>
    %23 = vector.shape_cast %22 : vector<4x2x8x8xf32> to vector<8x8x8xf32>
    %24 = vector.extract_strided_slice %20 {offsets = [0, 0, 8], sizes = [4, 16, 8], strides = [1, 1, 1]} : vector<4x16x24xf32> to vector<4x16x8xf32>
    %25 = vector.shape_cast %24 : vector<4x16x8xf32> to vector<4x2x8x8xf32>
    %26 = vector.shape_cast %25 : vector<4x2x8x8xf32> to vector<8x8x8xf32>
    %27 = vector.extract_strided_slice %20 {offsets = [0, 0, 16], sizes = [4, 16, 8], strides = [1, 1, 1]} : vector<4x16x24xf32> to vector<4x16x8xf32>
    %28 = vector.shape_cast %27 : vector<4x16x8xf32> to vector<4x2x8x8xf32>
    %29 = vector.shape_cast %28 : vector<4x2x8x8xf32> to vector<8x8x8xf32>
    "tpu.trace_start"() <{level = 10 : i32, message = "bqd,bkd->bqk"}> : () -> ()
    %cst_22 = arith.constant dense<0.000000e+00> : vector<8x8x8xf32>
    %30 = tpu.matmul %23, %26, %cst_22 {dimension_numbers = #tpu.dot_dimension_numbers<[2], [2], [1], [1], [0, 0, 0, 1, 1, 1], [0], [0]>, precision = #tpu.contract_precision<fp32>} : vector<8x8x8xf32>, vector<8x8x8xf32>, vector<8x8x8xf32> -> vector<8x8x8xf32>
    "tpu.trace_stop"() : () -> ()
    %cst_23 = arith.constant 0.353553385 : f32
    %31 = vector.broadcast %cst_23 : f32 to vector<8x8x8xf32>
    %32 = arith.mulf %30, %31 : vector<8x8x8xf32>
    %cst_24 = arith.constant dense<0xFF800000> : vector<8x8xf32>
    %33 = vector.multi_reduction <maximumf>, %32, %cst_24 [2] : vector<8x8x8xf32> to vector<8x8xf32>
    %34 = vector.shape_cast %33 : vector<8x8xf32> to vector<8x8x1xf32>
    %35 = vector.broadcast %34 : vector<8x8x1xf32> to vector<8x8x8xf32>
    %36 = arith.subf %32, %35 : vector<8x8x8xf32>
    %37 = math.exp %36 : vector<8x8x8xf32>
    %cst_25 = arith.constant dense<0.000000e+00> : vector<8x8xf32>
    %38 = vector.multi_reduction <add>, %37, %cst_25 [2] : vector<8x8x8xf32> to vector<8x8xf32>
    %39 = vector.shape_cast %38 : vector<8x8xf32> to vector<8x8x1xf32>
    %40 = vector.broadcast %39 : vector<8x8x1xf32> to vector<8x8x8xf32>
    %41 = arith.divf %37, %40 : vector<8x8x8xf32>
    "tpu.trace_start"() <{level = 10 : i32, message = "bqk,bkd->bqd"}> : () -> ()
    %cst_26 = arith.constant dense<0.000000e+00> : vector<8x8x8xf32>
    %42 = tpu.matmul %41, %29, %cst_26 {dimension_numbers = #tpu.dot_dimension_numbers<[2], [1], [1], [2], [0, 0, 0, 1, 1, 2], [0], [0]>, precision = #tpu.contract_precision<fp32>} : vector<8x8x8xf32>, vector<8x8x8xf32>, vector<8x8x8xf32> -> vector<8x8x8xf32>
    "tpu.trace_stop"() : () -> ()
    %43 = vector.shape_cast %42 : vector<8x8x8xf32> to vector<4x2x8x8xf32>
    %44 = vector.shape_cast %43 : vector<4x2x8x8xf32> to vector<4x16x8xf32>
    %c0_27 = arith.constant 0 : index
    %c0_28 = arith.constant 0 : index
    %c0_29 = arith.constant 0 : index
    %45 = vector.load %arg3[%c0_27, %c0_28, %c0_29] : memref<4x8x32xf32, #tpu.memory_space<vmem>>, vector<4x8x32xf32>
    "tpu.trace_start"() <{level = 10 : i32, message = "hbd,hde->hbe"}> : () -> ()
    %cst_30 = arith.constant dense<0.000000e+00> : vector<4x16x32xf32>
    %46 = tpu.matmul %44, %45, %cst_30 {dimension_numbers = #tpu.dot_dimension_numbers<[2], [1], [1], [2], [0, 0, 0, 1, 1, 2], [0], [0]>, precision = #tpu.contract_precision<fp32>} : vector<4x16x8xf32>, vector<4x8x32xf32>, vector<4x16x32xf32> -> vector<4x16x32xf32>
    "tpu.trace_stop"() : () -> ()
    %47 = vector.extract_strided_slice %46 {offsets = [0, 0, 0], sizes = [1, 16, 32], strides = [1, 1, 1]} : vector<4x16x32xf32> to vector<1x16x32xf32>
    %48 = vector.shape_cast %47 : vector<1x16x32xf32> to vector<16x32xf32>
    %49 = vector.extract_strided_slice %46 {offsets = [1, 0, 0], sizes = [1, 16, 32], strides = [1, 1, 1]} : vector<4x16x32xf32> to vector<1x16x32xf32>
    %50 = vector.shape_cast %49 : vector<1x16x32xf32> to vector<16x32xf32>
    %51 = arith.addf %48, %50 : vector<16x32xf32>
    %52 = vector.extract_strided_slice %46 {offsets = [2, 0, 0], sizes = [1, 16, 32], strides = [1, 1, 1]} : vector<4x16x32xf32> to vector<1x16x32xf32>
    %53 = vector.shape_cast %52 : vector<1x16x32xf32> to vector<16x32xf32>
    %54 = vector.extract_strided_slice %46 {offsets = [3, 0, 0], sizes = [1, 16, 32], strides = [1, 1, 1]} : vector<4x16x32xf32> to vector<1x16x32xf32>
    %55 = vector.shape_cast %54 : vector<1x16x32xf32> to vector<16x32xf32>
    %56 = arith.addf %53, %55 : vector<16x32xf32>
    %57 = arith.addf %51, %56 : vector<16x32xf32>
    %58 = arith.addf %57, %2 : vector<16x32xf32>
    %59 = arith.addf %0, %58 : vector<16x32xf32>
    %cst_31 = arith.constant dense<0.000000e+00> : vector<16xf32>
    %60 = vector.multi_reduction <add>, %59, %cst_31 [1] : vector<16x32xf32> to vector<16xf32>
    %61 = vector.shape_cast %60 : vector<16xf32> to vector<16x1xf32>
    %cst_32 = arith.constant 3.200000e+01 : f32
    %62 = vector.broadcast %cst_32 : f32 to vector<16x1xf32>
    %63 = arith.divf %61, %62 : vector<16x1xf32>
    %64 = vector.broadcast %63 : vector<16x1xf32> to vector<16x32xf32>
    %65 = arith.subf %59, %64 : vector<16x32xf32>
    %66 = arith.mulf %65, %65 : vector<16x32xf32>
    %cst_33 = arith.constant dense<0.000000e+00> : vector<16xf32>
    %67 = vector.multi_reduction <add>, %66, %cst_33 [1] : vector<16x32xf32> to vector<16xf32>
    %68 = vector.shape_cast %67 : vector<16xf32> to vector<16x1xf32>
    %cst_34 = arith.constant 3.200000e+01 : f32
    %69 = vector.broadcast %cst_34 : f32 to vector<16x1xf32>
    %70 = arith.divf %68, %69 : vector<16x1xf32>
    %71 = vector.broadcast %63 : vector<16x1xf32> to vector<16x32xf32>
    %72 = arith.subf %59, %71 : vector<16x32xf32>
    %cst_35 = arith.constant 9.99999974E-6 : f32
    %73 = vector.broadcast %cst_35 : f32 to vector<16x1xf32>
    %74 = arith.addf %70, %73 : vector<16x1xf32>
    %75 = math.sqrt %74 : vector<16x1xf32>
    %76 = vector.broadcast %75 : vector<16x1xf32> to vector<16x32xf32>
    %77 = arith.divf %72, %76 : vector<16x32xf32>
    %78 = arith.mulf %77, %8 : vector<16x32xf32>
    %79 = arith.addf %78, %10 : vector<16x32xf32>
    %c0_36 = arith.constant 0 : index
    %c0_37 = arith.constant 0 : index
    %80 = vector.load %arg4[%c0_36, %c0_37] : memref<32x64xf32, #tpu.memory_space<vmem>>, vector<32x64xf32>
    %cst_38 = arith.constant dense<0.000000e+00> : vector<16x64xf32>
    %81 = tpu.matmul %79, %80, %cst_38 {dimension_numbers = #tpu.dot_dimension_numbers<[1], [0], [0], [1], [0, 0, 1, 1], [], []>, precision = #tpu.contract_precision<fp32>} : vector<16x32xf32>, vector<32x64xf32>, vector<16x64xf32> -> vector<16x64xf32>
    %82 = arith.addf %81, %4 : vector<16x64xf32>
    %cst_39 = arith.constant 0.000000e+00 : f32
    %83 = vector.broadcast %cst_39 : f32 to vector<16x64xf32>
    %84 = arith.maximumf %82, %83 : vector<16x64xf32>
    %c0_40 = arith.constant 0 : index
    %c0_41 = arith.constant 0 : index
    %85 = vector.load %arg5[%c0_40, %c0_41] : memref<64x32xf32, #tpu.memory_space<vmem>>, vector<64x32xf32>
    %cst_42 = arith.constant dense<0.000000e+00> : vector<16x32xf32>
    %86 = tpu.matmul %84, %85, %cst_42 {dimension_numbers = #tpu.dot_dimension_numbers<[1], [0], [0], [1], [0, 0, 1, 1], [], []>, precision = #tpu.contract_precision<fp32>} : vector<16x64xf32>, vector<64x32xf32>, vector<16x32xf32> -> vector<16x32xf32>
    %87 = arith.addf %86, %6 : vector<16x32xf32>
    %88 = arith.addf %79, %87 : vector<16x32xf32>
    %cst_43 = arith.constant dense<0.000000e+00> : vector<16xf32>
    %89 = vector.multi_reduction <add>, %88, %cst_43 [1] : vector<16x32xf32> to vector<16xf32>
    %90 = vector.shape_cast %89 : vector<16xf32> to vector<16x1xf32>
    %cst_44 = arith.constant 3.200000e+01 : f32
    %91 = vector.broadcast %cst_44 : f32 to vector<16x1xf32>
    %92 = arith.divf %90, %91 : vector<16x1xf32>
    %93 = vector.broadcast %92 : vector<16x1xf32> to vector<16x32xf32>
    %94 = arith.subf %88, %93 : vector<16x32xf32>
    %95 = arith.mulf %94, %94 : vector<16x32xf32>
    %cst_45 = arith.constant dense<0.000000e+00> : vector<16xf32>
    %96 = vector.multi_reduction <add>, %95, %cst_45 [1] : vector<16x32xf32> to vector<16xf32>
    %97 = vector.shape_cast %96 : vector<16xf32> to vector<16x1xf32>
    %cst_46 = arith.constant 3.200000e+01 : f32
    %98 = vector.broadcast %cst_46 : f32 to vector<16x1xf32>
    %99 = arith.divf %97, %98 : vector<16x1xf32>
    %100 = vector.broadcast %92 : vector<16x1xf32> to vector<16x32xf32>
    %101 = arith.subf %88, %100 : vector<16x32xf32>
    %cst_47 = arith.constant 9.99999974E-6 : f32
    %102 = vector.broadcast %cst_47 : f32 to vector<16x1xf32>
    %103 = arith.addf %99, %102 : vector<16x1xf32>
    %104 = math.sqrt %103 : vector<16x1xf32>
    %105 = vector.broadcast %104 : vector<16x1xf32> to vector<16x32xf32>
    %106 = arith.divf %101, %105 : vector<16x32xf32>
    %107 = arith.mulf %106, %12 : vector<16x32xf32>
    %108 = arith.addf %107, %14 : vector<16x32xf32>
    %c0_48 = arith.constant 0 : index
    %c0_49 = arith.constant 0 : index
    %109 = vector.load %arg7[%c0_48, %c0_49] : memref<16x32xf32, #tpu.memory_space<vmem>>, vector<16x32xf32>
    tpu.vector_store %arg7[%c0_48, %c0_49], %108 {strides = array<i32>} : memref<16x32xf32, #tpu.memory_space<vmem>>, vector<16x32xf32>,
    return
  }
}

</mosaic_0001>

<bundles_post_ra>
// kernel: tpu_custom_call.1
= control target key start
LH: loop header
LB: loop body
LE: loop exit
PB: predicated region body
PF: predicated region fallthrough
CT: control target
= control target key end

     0   :  { %12 = vsyncpa [#allocation3], 0  ;;  %s16342_s0 = inlined_call_operand.vmem [shape: f32[16,32], index: 0, kind: input, shape index: {}]   ;;  %s16343_s1 = inlined_call_operand.vmem [shape: f32[4,32,24], index: 1, kind: input, shape index: {}]   ;;  %s16344_s2 = inlined_call_operand.vmem [shape: f32[4,16,24], index: 2, kind: input, shape index: {}]   ;;  %s16345_s3 = inlined_call_operand.vmem [shape: f32[4,8,32], index: 3, kind: input, shape index: {}]   ;;  %s16346_s4 = inlined_call_operand.hbm [shape: f32[32,64], index: 4, kind: input, shape index: {}]   ;;  %s16347_s5 = inlined_call_operand.vmem [shape: f32[64,32], index: 5, kind: input, shape index: {}]   ;;  %s16348_s6 = inlined_call_operand.vmem [shape: f32[7,16,64], index: 6, kind: input, shape index: {}]   ;;  %s16349_s7 = inlined_call_operand.hbm [shape: f32[16,32], index: 7, kind: output, shape index: {}]  }
   0x1   :  { %13 = vsyncpa [#allocation4], 0  ;;  %s15062_s24 = smov [#allocation2]   ;;  %s15014_s28 = scalar_lea.hbm %s16346_s4, 512 }
   0x2   :  { %s27_s25 = sshll.u32 %s15062_s24, 4  ;;  %p15015_p0 = scmp.ne.s32.totalorder %s16346_s4, %s15014_s28  ;;  %s28_s25 = int_to_ptr.vmem [resolvable:$true] %s27_s25 }
   0x3   :  { %p15018_p1 = scmp.lt.u32.totalorder %s15014_s28, %s16346_s4 }
   0x5   :  { %p15020_p2 = pnand %p15018_p1, %p15015_p0 }
   0x7   :  { %15023 = shalt.err (!%p15020_p2)
}
   0x8   :  { %s15024_s10 = scalar_lea.vmem %s28_s25, 512  ;;  %p15029_p4 = scmp.lt.s32.totalorder %s28_s25, %s28_s25 }
   0x9   :  { %p15025_p3 = scmp.ne.s32.totalorder %s28_s25, %s15024_s10  ;;  %p15030_p5 = scmp.lt.s32.totalorder %s15024_s10, %s15024_s10 }
   0xb   :  { %p15031_p6 = por %p15030_p5, %p15029_p4 }
   0xd   :  { %p15032_p7 = pnand %p15031_p6, %p15025_p3 }
   0xf   :  { %15035 = shalt.err (!%p15032_p7)
}
  0x10   :  { %s15063_s11 = smov 128   ;;  %s15064_s12 = smov 8  }
  0x11   :  { %33 = dma.hbm_to_vmem [thread:$0]  %s16346_s4, 512, %s28_s25, [#allocation3], %s15063_s11, %s15063_s11, %s15064_s12  }
  0x12   :  { %15058 = dma.done.wait [#allocation3], 512  }
  0x13   :  { %15059 = vsyncadd [#allocation3], 4294966784  ;;  %vm87_vm0 = vcmask 261120   ;;  %v63_v0 = vld [vmem:[%s16343_s1] sm:$0xff]  ;;  %v64_v1 = vld [vmem:[%s16343_s1 + $0x8] sm:$0xff]  ;;  %vm15066_vm1 = vmmov 0  }
  0x14   :  { %v65_v2 = vld [vmem:[%s16343_s1 + $0x10] sm:$0xff]  ;;  %v95_v3 = vand.u32 4294901760, %v63_v0  ;;  %v98_v4 = vand.u32 4294901760, %v64_v1  ;;  %v66_v5 = vld [vmem:[%s16343_s1 + $0x18] sm:$0xff]  ;;  %v41_v7 = vld [vmem:[%s16342_s0] sm:$0xff]  ;;  %s15067_s8 = smov 120  }
  0x15   :  { %v101_v6 = vand.u32 4294901760, %v65_v2  ;;  %v42_v8 = vld [vmem:[%s16342_s0 + $0x8] sm:$0xff]  ;;  %v104_v9 = vand.u32 4294901760, %v66_v5  ;;  %v89_v10 = vsel %vm87_vm0, %v41_v7, 0  ;;  %v15164_v20 = vld [vmem:[%s16343_s1 + $0x20] sm:$0xff]  ;;  %v15207_v35 = vld [vmem:[%s16343_s1 + $0x30] sm:$0xff] }
  0x16   :  { %v92_v11 = vsel %vm87_vm0, %v42_v8, 0  ;;  %v15145_v12 = vpack.c.bf16 %v98_v4, %v95_v3  ;;  %v15147_v13 = vand.u32 4294901760, %v89_v10  ;;  %v15151_v15 = vsub.f32 %v63_v0, %v95_v3  ;;  %v15192_v30 = vld [vmem:[%s16343_s1 + $0x28] sm:$0xff]  ;;  %v15218_v43 = vld [vmem:[%s16343_s1 + $0x38] sm:$0xff]  ;;  %s15069_s25 = smov [#allocation5]  }
  0x17   :  { %v15149_v14 = vand.u32 4294901760, %v92_v11  ;;  %v15153_v16 = vpack.c.bf16 %v104_v9, %v101_v6  ;;  %v15155_v17 = vsub.f32 %v64_v1, %v98_v4  ;;  %v15157_v18 = vsub.f32 %v65_v2, %v101_v6  ;;  %s12770_s26 = sshll.u32 %s15069_s25, 4  ;;  %s12771_s26 = int_to_ptr.vmem [resolvable:$true] %s12770_s26 }
  0x18   :  { %v15159_v19 = vsub.f32 %v66_v5, %v104_v9  ;;  %14343 = vmatprep.subr.bf16.mxu0 %v15145_v12  ;;  %v15168_v21 = vsub.f32 %v89_v10, %v15147_v13  ;;  %v186_v23 = vand.u32 4294901760, %v15151_v15  ;;  %13383 = vmatprep.mubr.f32.mxu1 %v15147_v13  ;;  %v623_v31 = vand.u32 4294901760, %v15164_v20  ;;  %s15036_s27 = scalar_lea.vmem %s12771_s26, 256  ;;  %p15041_p9 = scmp.lt.s32.totalorder %s12771_s26, %s12771_s26 }
  0x19   :  { %v15171_v22 = vsub.f32 %v92_v11, %v15149_v14  ;;  %14345 = vmatpush3.bf16.msra.mxu0 %v15145_v12  ;;  %v193_v24 = vand.u32 4294901760, %v15155_v17  ;;  %v200_v25 = vand.u32 4294901760, %v15157_v18  ;;  %v626_v42 = vand.u32 4294901760, %v15192_v30  ;;  %p15037_p8 = scmp.ne.s32.totalorder %s12771_s26, %s15036_s27  ;;  %p15042_p10 = scmp.lt.s32.totalorder %s15036_s27, %s15036_s27 }
  0x1a   :  { %v207_v26 = vand.u32 4294901760, %v15159_v19  ;;  %14347 = vmatprep.subr.bf16.mxu0 %v15153_v16  ;;  %v15181_v27 = vand.u32 4294901760, %v15168_v21  ;;  %v187_v29 = vsub.f32 %v15151_v15, %v186_v23  ;;  %v15227_v46 = vsub.f32 %v15164_v20, %v623_v31  ;;  %v76_v20 = vld [vmem:[%s16343_s1 + $0x68] sm:$0xff] }
  0x1b   :  { %v15184_v28 = vand.u32 4294901760, %v15171_v22  ;;  %v194_v32 = vsub.f32 %v15155_v17, %v193_v24  ;;  %v201_v33 = vsub.f32 %v15157_v18, %v200_v25  ;;  %v629_v47 = vand.u32 4294901760, %v15207_v35  ;;  %p15043_p11 = por %p15042_p10, %p15041_p9 }
  0x1c   :  { %v208_v34 = vsub.f32 %v15159_v19, %v207_v26  ;;  %v166_v36 = vsub.f32 %v15168_v21, %v15181_v27  ;;  %v188_v38 = vand.u32 4294901760, %v187_v29  ;;  %v15231_v50 = vsub.f32 %v15192_v30, %v626_v42 }
  0x1d   :  { %v176_v37 = vsub.f32 %v15171_v22, %v15184_v28  ;;  %14349 = vmatpush3.bf16.msra.mxu0 %v15153_v16  ;;  %v195_v39 = vand.u32 4294901760, %v194_v32  ;;  %v202_v40 = vand.u32 4294901760, %v201_v33  ;;  %v714_v51 = vand.u32 4294901760, %v15227_v46  ;;  %v77_v32 = vld [vmem:[%s16343_s1 + $0x70] sm:$0xff]  ;;  %v78_v33 = vld [vmem:[%s16343_s1 + $0x78] sm:$0xff]  ;;  %p15044_p12 = pnand %p15043_p11, %p15037_p8 }
  0x1e   :  { %v209_v41 = vand.u32 4294901760, %v208_v34  ;;  %v15220_v44 = vand.u32 4294901760, %v166_v36  ;;  %v632_v52 = vand.u32 4294901760, %v15218_v43  ;;  %v15237_v53 = vsub.f32 %v15207_v35, %v629_v47 }
  0x1f   :  { %v15222_v45 = vand.u32 4294901760, %v176_v37  ;;  %v14350_v48 = vpack.c.bf16 %v195_v39, %v188_v38  ;;  %v721_v54 = vand.u32 4294901760, %v15231_v50  ;;  %v715_v55 = vsub.f32 %v15227_v46, %v714_v51 }
  0x20   :  { %v14354_v49 = vpack.c.bf16 %v209_v41, %v202_v40  ;;  %13306 = vmatprep.mubr.f32.mxu0 %v15220_v44  ;;  %v728_v56 = vand.u32 4294901760, %v15237_v53  ;;  %v15247_v57 = vsub.f32 %v15218_v43, %v632_v52  ;;  %v14358_v58 = vpack.c.bf16 %v15155_v17, %v15151_v15  ;;  %v71_v15 = vld [vmem:[%s16343_s1 + $0x40] sm:$0xff]  ;;  %v72_v17 = vld [vmem:[%s16343_s1 + $0x48] sm:$0xff] }
  0x21   :  { %13307 = vmatmul.mubr.f32.vlgmr.msra.gmra.mrb[0].mxu0 %v15222_v45  ;;  %14351 = vmatprep.subr.bf16.mxu0 %v14350_v48  ;;  %v722_v59 = vsub.f32 %v15231_v50, %v721_v54  ;;  %v716_v60 = vand.u32 4294901760, %v715_v55  ;;  %v14362_v2 = vpack.c.bf16 %v15159_v19, %v15157_v18  ;;  %v14406_v6 = vpack.c.bf16 %v15231_v50, %v15227_v46  ;;  %v75_v19 = vld [vmem:[%s16343_s1 + $0x60] sm:$0xff] }
  0x22   :  { %14353 = vmatpush3.bf16.msra.mxu0 %v14350_v48  ;;  %13317 = vmatprep.mubr.f32.mxu0 %v15147_v13  ;;  %v729_v61 = vsub.f32 %v15237_v53, %v728_v56  ;;  %v735_v62 = vand.u32 4294901760, %v15247_v57  ;;  %v14410_v7 = vpack.c.bf16 %v15247_v57, %v15237_v53  ;;  %v14374_v8 = vpack.c.bf16 %v193_v24, %v186_v23 }
  0x23   :  { %14355 = vmatprep.subr.bf16.mxu0 %v14354_v49  ;;  %v723_v63 = vand.u32 4294901760, %v722_v59  ;;  %v15278_v9 = vpack.c.bf16 %v626_v42, %v623_v31  ;;  %v14378_v10 = vpack.c.bf16 %v207_v26, %v200_v25  ;;  %v15286_v11 = vpack.c.bf16 %v632_v52, %v629_v47  ;;  %v73_v25 = vld [vmem:[%s16343_s1 + $0x50] sm:$0xff]  ;;  %v74_v26 = vld [vmem:[%s16343_s1 + $0x58] sm:$0xff] }
  0x24   :  { %v730_v0 = vand.u32 4294901760, %v729_v61  ;;  %v736_v1 = vsub.f32 %v15247_v57, %v735_v62  ;;  %v14422_v18 = vpack.c.bf16 %v721_v54, %v714_v51  ;;  %v1151_v23 = vand.u32 4294901760, %v71_v15 }
  0x25   :  { %v14398_v3 = vpack.c.bf16 %v723_v63, %v716_v60  ;;  %v1154_v24 = vand.u32 4294901760, %v72_v17  ;;  %v14426_v29 = vpack.c.bf16 %v735_v62, %v728_v56  ;;  %v1679_v30 = vand.u32 4294901760, %v75_v19 }
  0x26   :  { %14357 = vmatpush3.bf16.msra.mxu0 %v14354_v49  ;;  %v737_v4 = vand.u32 4294901760, %v736_v1  ;;  %v1682_v31 = vand.u32 4294901760, %v76_v20  ;;  %v1157_v34 = vand.u32 4294901760, %v73_v25  ;;  %v1160_v35 = vand.u32 4294901760, %v74_v26 }
  0x27   :  { %14359 = vmatprep.subr.bf16.mxu0 %v14358_v58  ;;  %14399 = vmatprep.subr.bf16.mxu1 %v14398_v3  ;;  %v15329_v36 = vsub.f32 %v71_v15, %v1151_v23  ;;  %v15331_v37 = vsub.f32 %v72_v17, %v1154_v24  ;;  %v1688_v38 = vand.u32 4294901760, %v78_v33  ;;  %v15334_v39 = vsub.f32 %v75_v19, %v1679_v30 }
  0x28   :  { %v14402_v5 = vpack.c.bf16 %v737_v4, %v730_v0  ;;  %14401 = vmatpush3.bf16.msra.mxu1 %v14398_v3  ;;  %v15336_v40 = vsub.f32 %v76_v20, %v1682_v31  ;;  %v15342_v43 = vsub.f32 %v73_v25, %v1157_v34  ;;  %v15344_v46 = vsub.f32 %v74_v26, %v1160_v35 }
  0x29   :  { %13318 = vmatmul.mubr.f32.vlgmr.msra.gmra.mrb[0].mxu0 %v15149_v14  ;;  %v1242_v41 = vand.u32 4294901760, %v15329_v36  ;;  %v1249_v42 = vand.u32 4294901760, %v15331_v37  ;;  %v1770_v47 = vand.u32 4294901760, %v15334_v39  ;;  %v15352_v49 = vsub.f32 %v78_v33, %v1688_v38 }
  0x2a   :  { %14361 = vmatpush3.bf16.msra.mxu0 %v14358_v58  ;;  %13328 = vmatprep.mubr.f32.mxu0 %v15168_v21  ;;  %v1777_v48 = vand.u32 4294901760, %v15336_v40  ;;  %v15356_v50 = vpack.c.bf16 %v1154_v24, %v1151_v23  ;;  %v1256_v53 = vand.u32 4294901760, %v15342_v43  ;;  %v1263_v54 = vand.u32 4294901760, %v15344_v46 }
  0x2b   :  { %14363 = vmatprep.subr.bf16.mxu0 %v14362_v2  ;;  %14403 = vmatprep.subr.bf16.mxu1 %v14402_v5  ;;  %v1243_v51 = vsub.f32 %v15329_v36, %v1242_v41  ;;  %v1250_v52 = vsub.f32 %v15331_v37, %v1249_v42  ;;  %v15370_v55 = vpack.c.bf16 %v1682_v31, %v1679_v30  ;;  %v1791_v59 = vand.u32 4294901760, %v15352_v49  ;;  %v81_v30 = vld [vmem:[%s16344_s2 + $0x10] sm:$0xff] }
  0x2c   :  { %14405 = vmatpush3.bf16.msra.mxu1 %v14402_v5  ;;  %v1771_v56 = vsub.f32 %v15334_v39, %v1770_v47  ;;  %v1778_v57 = vsub.f32 %v15336_v40, %v1777_v48  ;;  %v15382_v60 = vpack.c.bf16 %v1160_v35, %v1157_v34  ;;  %v1257_v63 = vsub.f32 %v15342_v43, %v1256_v53 }
  0x2d   :  { %14407 = vmatprep.subr.bf16.mxu1 %v14406_v6  ;;  %v1244_v61 = vand.u32 4294901760, %v1243_v51  ;;  %v1251_v62 = vand.u32 4294901760, %v1250_v52  ;;  %v1264_v0 = vsub.f32 %v15344_v46, %v1263_v54  ;;  %v1792_v5 = vsub.f32 %v15352_v49, %v1791_v59 }
  0x2e   :  { %14365 = vmatpush3.bf16.msra.mxu0 %v14362_v2  ;;  %v1772_v2 = vand.u32 4294901760, %v1771_v56  ;;  %v1779_v3 = vand.u32 4294901760, %v1778_v57  ;;  %v14458_v19 = vpack.c.bf16 %v15344_v46, %v15342_v43  ;;  %v14474_v23 = vpack.c.bf16 %v1263_v54, %v1256_v53  ;;  %v85_v46 = vld [vmem:[%s16344_s2 + $0x30] sm:$0xff] }
  0x2f   :  { %14367 = vmatprep.subr.bf16.mxu0 %v15145_v12  ;;  %13384 = vmatmul.mubr.f32.vlgmr.msra.gmra.mrb[0].mxu1 %v15149_v14  ;;  %vm2209_vm2 = vcmask 64512   ;;  %vm12130_vm7 = vcmask 523264  }
  0x30   :  { %14409 = vmatpush3.bf16.msra.mxu1 %v14406_v6  ;;  %13394 = vmatprep.mubr.f32.mxu1 %v15168_v21  ;;  %v14446_v6 = vpack.c.bf16 %v1251_v62, %v1244_v61 }
  0x31   :  { %13329 = vmatmul.mubr.f32.vlgmr.msra.gmra.mrb[0].mxu0 %v15171_v22  ;;  %14411 = vmatprep.subr.bf16.mxu1 %v14410_v7 }
  0x32   :  { %14369 = vmatpush3.bf16.msra.mxu0 %v15145_v12  ;;  %13339 = vmatprep.mubr.f32.mxu0 %v15181_v27 }
  0x33   :  { %14371 = vmatprep.subr.bf16.mxu0 %v15153_v16 }
  0x34   :  { %14413 = vmatpush3.bf16.msra.mxu1 %v14410_v7  ;;  %v1258_v7 = vand.u32 4294901760, %v1257_v63 }
  0x35   :  { %14415 = vmatprep.subr.bf16.mxu1 %v15278_v9 }
  0x36   :  { %14373 = vmatpush3.bf16.msra.mxu0 %v15153_v16 }
  0x37   :  { %14375 = vmatprep.subr.bf16.mxu0 %v14374_v8  ;;  %13395 = vmatmul.mubr.f32.vlgmr.msra.gmra.mrb[0].mxu1 %v15171_v22 }
  0x38   :  { %14417 = vmatpush3.bf16.msra.mxu1 %v15278_v9  ;;  %13405 = vmatprep.mubr.f32.mxu1 %v15181_v27 }
  0x39   :  { %13340 = vmatmul.mubr.f32.vlgmr.msra.gmra.mrb[0].mxu0 %v15184_v28  ;;  %14419 = vmatprep.subr.bf16.mxu1 %v15286_v11 }
  0x3a   :  { %14377 = vmatpush3.bf16.msra.mxu0 %v14374_v8  ;;  %13350 = vmatprep.mubr.f32.mxu0 %v15147_v13  ;;  %v1265_v8 = vand.u32 4294901760, %v1264_v0 }
  0x3b   :  { %14379 = vmatprep.subr.bf16.mxu0 %v14378_v10 }
  0x3c   :  { %14421 = vmatpush3.bf16.msra.mxu1 %v15286_v11  ;;  %v14450_v15 = vpack.c.bf16 %v1265_v8, %v1258_v7 }
  0x3d   :  { %14423 = vmatprep.subr.bf16.mxu1 %v14422_v18 }
  0x3e   :  { %14381 = vmatpush3.bf16.msra.mxu0 %v14378_v10 }
  0x3f   :  { %14383 = vmatprep.subr.bf16.mxu0 %v15145_v12  ;;  %13406 = vmatmul.mubr.f32.vlgmr.msra.gmra.mrb[0].mxu1 %v15184_v28 }
  0x40   :  { %14425 = vmatpush3.bf16.msra.mxu1 %v14422_v18  ;;  %13416 = vmatprep.mubr.f32.mxu1 %v15147_v13  ;;  %v14502_v18 = vpack.c.bf16 %v15336_v40, %v15334_v39  ;;  %v83_v39 = vld [vmem:[%s16344_s2 + $0x20] sm:$0xff] }
  0x41   :  { %13351 = vmatmul.mubr.f32.vlgmr.msra.gmra.mrb[0].mxu0 %v15149_v14  ;;  %14427 = vmatprep.subr.bf16.mxu1 %v14426_v29 }
  0x42   :  { %14385 = vmatpush3.bf16.msra.mxu0 %v15145_v12  ;;  %13361 = vmatprep.mubr.f32.mxu0 %v15147_v13  ;;  %v1685_v12 = vand.u32 4294901760, %v77_v32 }
  0x43   :  { %14387 = vmatprep.subr.bf16.mxu0 %v15153_v16 }
  0x44   :  { %14429 = vmatpush3.bf16.msra.mxu1 %v14426_v29  ;;  %v15392_v1 = vpack.c.bf16 %v1688_v38, %v1685_v12  ;;  %v82_v29 = vld [vmem:[%s16344_s2 + $0x18] sm:$0xff]  ;;  %v84_v38 = vld [vmem:[%s16344_s2 + $0x28] sm:$0xff] }
  0x45   :  { %14431 = vmatprep.subr.bf16.mxu1 %v15278_v9 }
  0x46   :  { %14389 = vmatpush3.bf16.msra.mxu0 %v15153_v16  ;;  %v15350_v16 = vsub.f32 %v77_v32, %v1685_v12 }
  0x47   :  { %14391 = vmatprep.subr.bf16.mxu0 %v15278_v9  ;;  %13417 = vmatmul.mubr.f32.vlgmr.msra.gmra.mrb[0].mxu1 %v15149_v14 }
  0x48   :  { %14433 = vmatpush3.bf16.msra.mxu1 %v15278_v9  ;;  %13427 = vmatprep.mubr.f32.mxu1 %v15147_v13  ;;  %v1784_v58 = vand.u32 4294901760, %v15350_v16  ;;  %v14506_v20 = vpack.c.bf16 %v15352_v49, %v15350_v16 }
  0x49   :  { %13362 = vmatmul.mubr.f32.vlgmr.msra.gmra.mrb[0].mxu0 %v15149_v14  ;;  %14435 = vmatprep.subr.bf16.mxu1 %v15286_v11 }
  0x4a   :  { %14393 = vmatpush3.bf16.msra.mxu0 %v15278_v9  ;;  %13372 = vmatprep.mubr.f32.mxu0 %v15220_v44  ;;  %v1785_v4 = vsub.f32 %v15350_v16, %v1784_v58  ;;  %v14494_v9 = vpack.c.bf16 %v1779_v3, %v1772_v2 }
  0x4b   :  { %14395 = vmatprep.subr.bf16.mxu0 %v15286_v11 }
  0x4c   :  { %14437 = vmatpush3.bf16.msra.mxu1 %v15286_v11  ;;  %v1786_v10 = vand.u32 4294901760, %v1785_v4 }
  0x4d   :  { %14487 = vmatprep.subr.bf16.mxu1 %v15370_v55 }
  0x4e   :  { %14397 = vmatpush3.bf16.msra.mxu0 %v15286_v11  ;;  %v1793_v11 = vand.u32 4294901760, %v1792_v5 }
  0x4f   :  { %14439 = vmatprep.subr.bf16.mxu0 %v15356_v50  ;;  %13428 = vmatmul.mubr.f32.vlgmr.msra.gmra.mrb[0].mxu1 %v15149_v14 }
  0x50   :  { %14489 = vmatpush3.bf16.msra.mxu1 %v15370_v55  ;;  %13504 = vmatprep.mubr.f32.mxu1 %v15220_v44  ;;  %v14498_v17 = vpack.c.bf16 %v1793_v11, %v1786_v10 }
  0x51   :  { %13373 = vmatmul.mubr.f32.vlgmr.msra.gmra.mrb[2].mxu0 %v15222_v45  ;;  %14491 = vmatprep.subr.bf16.mxu1 %v15392_v1 }
  0x52   :  { %14441 = vmatpush3.bf16.msra.mxu0 %v15356_v50  ;;  %13438 = vmatprep.mubr.f32.mxu0 %v15220_v44  ;;  %v14454_v44 = vpack.c.bf16 %v15331_v37, %v15329_v36 }
  0x53   :  { %14443 = vmatprep.subr.bf16.mxu0 %v15382_v60 }
  0x54   :  { %14493 = vmatpush3.bf16.msra.mxu1 %v15392_v1 }
  0x55   :  { %14495 = vmatprep.subr.bf16.mxu1 %v14494_v9 }
  0x56   :  { %14445 = vmatpush3.bf16.msra.mxu0 %v15382_v60 }
  0x57   :  { %14447 = vmatprep.subr.bf16.mxu0 %v14446_v6  ;;  %13505 = vmatmul.mubr.f32.vlgmr.msra.gmra.mrb[2].mxu1 %v15222_v45 }
  0x58   :  { %14497 = vmatpush3.bf16.msra.mxu1 %v14494_v9  ;;  %13515 = vmatprep.mubr.f32.mxu1 %v15147_v13 }
  0x59   :  { %13439 = vmatmul.mubr.f32.vlgmr.msra.gmra.mrb[4].mxu0 %v15222_v45  ;;  %14499 = vmatprep.subr.bf16.mxu1 %v14498_v17  ;;  %v14518_v45 = vpack.c.bf16 %v1777_v48, %v1770_v47 }
  0x5a   :  { %14449 = vmatpush3.bf16.msra.mxu0 %v14446_v6  ;;  %13449 = vmatprep.mubr.f32.mxu0 %v15147_v13 }
  0x5b   :  { %14451 = vmatprep.subr.bf16.mxu0 %v14450_v15 }
  0x5c   :  { %14501 = vmatpush3.bf16.msra.mxu1 %v14498_v17 }
  0x5d   :  { %14503 = vmatprep.subr.bf16.mxu1 %v14502_v18 }
  0x5e   :  { %14453 = vmatpush3.bf16.msra.mxu0 %v14450_v15 }
  0x5f   :  { %14455 = vmatprep.subr.bf16.mxu0 %v14454_v44  ;;  %13516 = vmatmul.mubr.f32.vlgmr.msra.gmra.mrb[2].mxu1 %v15149_v14 }
  0x60   :  { %14505 = vmatpush3.bf16.msra.mxu1 %v14502_v18  ;;  %13526 = vmatprep.mubr.f32.mxu1 %v15168_v21 }
  0x61   :  { %13450 = vmatmul.mubr.f32.vlgmr.msra.gmra.mrb[4].mxu0 %v15149_v14  ;;  %14507 = vmatprep.subr.bf16.mxu1 %v14506_v20 }
  0x62   :  { %14457 = vmatpush3.bf16.msra.mxu0 %v14454_v44  ;;  %13460 = vmatprep.mubr.f32.mxu0 %v15168_v21  ;;  %v14470_v21 = vpack.c.bf16 %v1249_v42, %v1242_v41  ;;  %v86_v41 = vld [vmem:[%s16344_s2 + $0x38] sm:$0xff] }
  0x63   :  { %14459 = vmatprep.subr.bf16.mxu0 %v14458_v19 }
  0x64   :  { %14509 = vmatpush3.bf16.msra.mxu1 %v14506_v20 }
  0x65   :  { %14511 = vmatprep.subr.bf16.mxu1 %v15370_v55 }
  0x66   :  { %14461 = vmatpush3.bf16.msra.mxu0 %v14458_v19 }
  0x67   :  { %14463 = vmatprep.subr.bf16.mxu0 %v15356_v50  ;;  %13527 = vmatmul.mubr.f32.vlgmr.msra.gmra.mrb[2].mxu1 %v15171_v22 }
  0x68   :  { %14513 = vmatpush3.bf16.msra.mxu1 %v15370_v55  ;;  %13537 = vmatprep.mubr.f32.mxu1 %v15181_v27 }
  0x69   :  { %13461 = vmatmul.mubr.f32.vlgmr.msra.gmra.mrb[4].mxu0 %v15171_v22  ;;  %14515 = vmatprep.subr.bf16.mxu1 %v15392_v1  ;;  %v14522_v22 = vpack.c.bf16 %v1791_v59, %v1784_v58 }
  0x6a   :  { %14465 = vmatpush3.bf16.msra.mxu0 %v15356_v50  ;;  %13471 = vmatprep.mubr.f32.mxu0 %v15181_v27  ;;  %v15065_v27 = vmov 0.0  }
  0x6b   :  { %14467 = vmatprep.subr.bf16.mxu0 %v15382_v60 }
  0x6c   :  { %14517 = vmatpush3.bf16.msra.mxu1 %v15392_v1 }
  0x6d   :  { %14519 = vmatprep.subr.bf16.mxu1 %v14518_v45 }
  0x6e   :  { %14469 = vmatpush3.bf16.msra.mxu0 %v15382_v60 }
  0x6f   :  { %14471 = vmatprep.subr.bf16.mxu0 %v14470_v21  ;;  %13538 = vmatmul.mubr.f32.vlgmr.msra.gmra.mrb[2].mxu1 %v15184_v28 }
  0x70   :  { %14521 = vmatpush3.bf16.msra.mxu1 %v14518_v45  ;;  %13548 = vmatprep.mubr.f32.mxu1 %v15147_v13 }
  0x71   :  { %13472 = vmatmul.mubr.f32.vlgmr.msra.gmra.mrb[4].mxu0 %v15184_v28  ;;  %14523 = vmatprep.subr.bf16.mxu1 %v14522_v22 }
  0x72   :  { %14473 = vmatpush3.bf16.msra.mxu0 %v14470_v21  ;;  %13482 = vmatprep.mubr.f32.mxu0 %v15147_v13 }
  0x73   :  { %14475 = vmatprep.subr.bf16.mxu0 %v14474_v23 }
  0x74   :  { %14525 = vmatpush3.bf16.msra.mxu1 %v14522_v22 }
  0x75   :  { %14527 = vmatprep.subr.bf16.mxu1 %v15370_v55 }
  0x76   :  { %14477 = vmatpush3.bf16.msra.mxu0 %v14474_v23 }
  0x77   :  { %14479 = vmatprep.subr.bf16.mxu0 %v15356_v50  ;;  %13549 = vmatmul.mubr.f32.vlgmr.msra.gmra.mrb[2].mxu1 %v15149_v14 }
  0x78   :  { %14529 = vmatpush3.bf16.msra.mxu1 %v15370_v55  ;;  %13559 = vmatprep.mubr.f32.mxu1 %v15147_v13 }
  0x79   :  { %13483 = vmatmul.mubr.f32.vlgmr.msra.gmra.mrb[4].mxu0 %v15149_v14  ;;  %14531 = vmatprep.subr.bf16.mxu1 %v15392_v1 }
  0x7a   :  { %14481 = vmatpush3.bf16.msra.mxu0 %v15356_v50  ;;  %13493 = vmatprep.mubr.f32.mxu0 %v15147_v13  ;;  %v79_v13 = vld [vmem:[%s16344_s2] sm:$0xff] }
  0x7b   :  { %14483 = vmatprep.subr.bf16.mxu0 %v15382_v60 }
  0x7c   :  { %14533 = vmatpush3.bf16.msra.mxu1 %v15392_v1 }
  0x7d   :  { %13592 = vmatprep.subr.mxu1 %v15065_v27 }
  0x7e   :  { %14485 = vmatpush3.bf16.msra.mxu0 %v15382_v60 }
  0x7f   :  { %13560 = vmatmul.mubr.f32.vlgmr.msra.gmra.mrb[2].mxu1 %v15149_v14  ;;  %13562 = vmatprep.subr.mxu0 %v15065_v27 }
  0x80   :  { %13594 = vmatprep.mubr.msk.f32.mxu1 %vm15066_vm1, %v15065_v27 }
  0x81   :  { %13494 = vmatmul.mubr.f32.vlgmr.msra.gmra.mrb[4].mxu0 %v15149_v14  ;;  %v80_v14 = vld [vmem:[%s16344_s2 + $0x8] sm:$0xff]  ;;  %s15068_s2 = smov 112  }
  0x82   :  { %13564 = vmatprep.mubr.msk.f32.mxu0 %vm15066_vm1, %v15065_v27 }
 0x11c   :  { %v13363_v28 = vpop.f32.mrb[0].mxu0 }
 0x11d   :  { %v612_v24 = vpop.f32.mrb[1].mxu0  ;;  %v15489_v26 = vadd.f32 %v13363_v28, %v80_v14 }
 0x11e   :  { %v15482_v25 = vadd.f32 %v612_v24, %v79_v13 }
 0x11f   :  { %v2663_v53 = vsel %vm2209_vm2, %v15489_v26, 0 }
 0x120   :  { %2207 = vrot.lane.b32.xlu0 %v15482_v25, %s15067_s8  ;;  %v2210_v51 = vsel %vm2209_vm2, %v15482_v25, 0  ;;  %v15541_v54 = vand.u32 4294901760, %v2663_v53 }
 0x121   :  { %v15537_v52 = vand.u32 4294901760, %v2210_v51 }
 0x122   :  { %v13429_v35 = vpop.f32.mrb[0].mxu1  ;;  %v2734_v56 = vsub.f32 %v2663_v53, %v15541_v54 }
 0x123   :  { %v1140_v37 = vpop.f32.mrb[1].mxu1  ;;  %v2281_v55 = vsub.f32 %v2210_v51, %v15537_v52 }
 0x124   :  { %2661 = vrot.lane.b32.xlu0 %v15489_v26, %s15067_s8  ;;  %v13374_v31 = vpop.f32.mrb[2].mxu0  ;;  %v2735_v61 = vand.u32 4294901760, %v2734_v56 }
 0x125   :  { %v708_v32 = vadd.f32 %v13374_v31, %v82_v29  ;;  %v697_v33 = vpop.f32.mrb[3].mxu0  ;;  %v2282_v57 = vand.u32 4294901760, %v2281_v55 }
 0x126   :  { %v698_v34 = vadd.f32 %v697_v33, %v81_v30  ;;  %v2736_v3 = vsub.f32 %v2734_v56, %v2735_v61 }
 0x127   :  { %v15499_v36 = vadd.f32 %v13429_v35, %v708_v32  ;;  %v2283_v60 = vsub.f32 %v2281_v55, %v2282_v57 }
 0x128   :  { %v15501_v12 = vadd.f32 %v1140_v37, %v698_v34  ;;  %v2737_v8 = vand.u32 4294901760, %v2736_v3 }
 0x129   :  { %v2284_v2 = vand.u32 4294901760, %v2283_v60  ;;  %v3569_v23 = vsel %vm2209_vm2, %v15499_v36, 0 }
 0x12a   :  { %3114 = vrot.lane.b32.xlu1 %v15501_v12, %s15067_s8  ;;  %v3116_v44 = vsel %vm2209_vm2, %v15501_v12, 0  ;;  %v15591_v13 = vand.u32 4294901760, %v3569_v23 }
 0x12b   :  { %v15579_v20 = vand.u32 4294901760, %v3116_v44 }
 0x12c   :  { %v3640_v29 = vsub.f32 %v3569_v23, %v15591_v13 }
 0x12d   :  { %v3187_v28 = vsub.f32 %v3116_v44, %v15579_v20 }
 0x12e   :  { %3567 = vrot.lane.b32.xlu1 %v15499_v36, %s15067_s8  ;;  %v3641_v35 = vand.u32 4294901760, %v3640_v29 }
 0x12f   :  { %v3188_v31 = vand.u32 4294901760, %v3187_v28 }
 0x131   :  { %v3189_v34 = vsub.f32 %v3187_v28, %v3188_v31 }
 0x152   :  { %v13561_v48 = vpop.f32.mrb[2].mxu1 }
 0x153   :  { %v15525_v16 = vadd.f32 %v13561_v48, %v86_v41  ;;  %v2196_v49 = vpop.f32.mrb[3].mxu1 }
 0x154   :  { %v13495_v40 = vpop.f32.mrb[4].mxu0  ;;  %v15529_v50 = vadd.f32 %v2196_v49, %v85_v46 }
 0x155   :  { %v15516_v42 = vadd.f32 %v13495_v40, %v84_v38  ;;  %v1668_v43 = vpop.f32.mrb[5].mxu0  ;;  %v3642_v40 = vsub.f32 %v3640_v29, %v3641_v35 }
 0x156   :  { %v15521_v47 = vadd.f32 %v1668_v43, %v83_v39  ;;  %v3190_v39 = vand.u32 4294901760, %v3189_v34 }
 0x157   :  { %4473 = vrot.lane.b32.xlu1 %v15516_v42, %s15067_s8  ;;  %v3643_v43 = vand.u32 4294901760, %v3642_v40 }
 0x158   :  { %4020 = vrot.lane.b32.xlu0 %v15521_v47, %s15067_s8  ;;  %v4022_v48 = vsel %vm2209_vm2, %v15521_v47, 0 }
 0x15b   :  { %5379 = vrot.lane.b32.xlu1 %v15525_v16, %s15067_s8 }
 0x15c   :  { %4926 = vrot.lane.b32.xlu0 %v15529_v50, %s15067_s8 }
 0x192   :  { %v2208_v58 = vpop.permute.xlu0 %2207 }
 0x193   :  { %v2212_v59 = vsel %vm2209_vm2, %v2208_v58, 0 }
 0x194   :  { %v15546_v62 = vand.u32 4294901760, %v2212_v59 }
 0x196   :  { %v2292_v63 = vsub.f32 %v2212_v59, %v15546_v62  ;;  %13563 = vmatpush3.xpose.msra.mxu0 %v15546_v62  ;;  %v2662_v0 = vpop.permute.xlu0 %2661 }
 0x197   :  { %v2665_v1 = vsel %vm2209_vm2, %v2662_v0, 0  ;;  %13567 = vmatprep.subr.mxu0 %v15065_v27 }
 0x198   :  { %v2293_v4 = vand.u32 4294901760, %v2292_v63  ;;  %v2668_v5 = vand.u32 4294901760, %v2665_v1 }
 0x199   :  { %13565 = vmatmul.mubr.f32.vlgmr.msra.gmra.mrb[6].mxu0 %v2284_v2 }
 0x19a   :  { %v2294_v6 = vsub.f32 %v2292_v63, %v2293_v4  ;;  %v2745_v7 = vsub.f32 %v2665_v1, %v2668_v5  ;;  %13593 = vmatpush3.xpose.msra.mxu1 %v2668_v5  ;;  %13569 = vmatprep.mubr.msk.f32.mxu0 %vm15066_vm1, %v15065_v27 }
 0x19b   :  { %13597 = vmatprep.subr.mxu1 %v15065_v27 }
 0x19c   :  { %v2295_v9 = vand.u32 4294901760, %v2294_v6  ;;  %v2746_v10 = vand.u32 4294901760, %v2745_v7  ;;  %v3115_v17 = vpop.permute.xlu1 %3114 }
 0x19d   :  { %13595 = vmatmul.mubr.f32.vlgmr.msra.gmra.mrb[4].mxu1 %v2737_v8  ;;  %v3118_v18 = vsel %vm2209_vm2, %v3115_v17, 0 }
 0x19e   :  { %v2747_v11 = vsub.f32 %v2745_v7, %v2746_v10  ;;  %13568 = vmatpush3.xpose.msra.mxu0 %v2295_v9  ;;  %13599 = vmatprep.mubr.msk.f32.mxu1 %vm15066_vm1, %v15065_v27  ;;  %v15582_v21 = vand.u32 4294901760, %v3118_v18 }
 0x19f   :  { %13572 = vmatprep.subr.mxu0 %v15065_v27 }
 0x1a0   :  { %v2748_v15 = vand.u32 4294901760, %v2747_v11  ;;  %v3568_v19 = vpop.permute.xlu1 %3567  ;;  %v3198_v24 = vsub.f32 %v3118_v18, %v15582_v21  ;;  %v4928_v11 = vsel %vm2209_vm2, %v15529_v50, 0 }
 0x1a1   :  { %13570 = vmatmul.mubr.f32.vlgmr.msra.gmra.mrb[6].mxu0 %v15537_v52  ;;  %v3571_v45 = vsel %vm2209_vm2, %v3568_v19, 0  ;;  %v15720_v44 = vand.u32 4294901760, %v4928_v11 }
 0x1a2   :  { %13573 = vmatpush3.xpose.msra.mxu0 %v2292_v63  ;;  %13598 = vmatpush3.xpose.msra.mxu1 %v2748_v15  ;;  %v15589_v22 = vand.u32 4294901760, %v3571_v45  ;;  %v3199_v30 = vand.u32 4294901760, %v3198_v24 }
 0x1a3   :  { %13602 = vmatprep.subr.mxu1 %v15065_v27  ;;  %13574 = vmatprep.mubr.msk.f32.mxu0 %vm15066_vm1, %v15065_v27  ;;  %v4999_v23 = vsub.f32 %v4928_v11, %v15720_v44 }
 0x1a4   :  { %13577 = vmatprep.subr.mxu0 %v15065_v27  ;;  %v15601_v14 = vsub.f32 %v3571_v45, %v15589_v22  ;;  %v3200_v33 = vsub.f32 %v3198_v24, %v3199_v30 }
 0x1a5   :  { %13600 = vmatmul.mubr.f32.vlgmr.msra.gmra.mrb[4].mxu1 %v15541_v54 }
 0x1a6   :  { %13603 = vmatpush3.xpose.msra.mxu1 %v2745_v7  ;;  %13604 = vmatprep.mubr.msk.f32.mxu1 %vm15066_vm1, %v15065_v27  ;;  %v3652_v32 = vand.u32 4294901760, %v15601_v14  ;;  %v3201_v38 = vand.u32 4294901760, %v3200_v33 }
 0x1a7   :  { %13607 = vmatprep.subr.mxu1 %v15065_v27 }
 0x1a8   :  { %v3653_v37 = vsub.f32 %v15601_v14, %v3652_v32 }
 0x1a9   :  { %13575 = vmatmul.mubr.f32.vlgmr.msra.gmra.mrb[6].mxu0 %v2281_v55  ;;  %v4475_v55 = vsel %vm2209_vm2, %v15516_v42, 0 }
 0x1aa   :  { %13578 = vmatpush3.xpose.msra.mxu0 %v15546_v62  ;;  %13579 = vmatprep.mubr.msk.f32.mxu0 %vm15066_vm1, %v15065_v27  ;;  %v3654_v41 = vand.u32 4294901760, %v3653_v37 }
 0x1ab   :  { %13582 = vmatprep.subr.mxu0 %v15065_v27 }
 0x1ad   :  { %13605 = vmatmul.mubr.f32.vlgmr.msra.gmra.mrb[4].mxu1 %v2734_v56 }
 0x1ae   :  { %13608 = vmatpush3.xpose.msra.mxu1 %v2668_v5  ;;  %13609 = vmatprep.mubr.msk.f32.mxu1 %vm15066_vm1, %v15065_v27 }
 0x1af   :  { %13612 = vmatprep.subr.mxu1 %v15065_v27 }
 0x1b1   :  { %13580 = vmatmul.mubr.f32.vlgmr.msra.gmra.mrb[6].mxu0 %v2282_v57  ;;  %v15661_v57 = vand.u32 4294901760, %v4475_v55 }
 0x1b2   :  { %13583 = vmatpush3.xpose.msra.mxu0 %v2293_v4  ;;  %13584 = vmatprep.mubr.msk.f32.mxu0 %vm15066_vm1, %v15065_v27 }
 0x1b3   :  { %13587 = vmatprep.subr.mxu0 %v15065_v27 }
 0x1b5   :  { %13610 = vmatmul.mubr.f32.vlgmr.msra.gmra.mrb[4].mxu1 %v2735_v61  ;;  %v4546_v61 = vsub.f32 %v4475_v55, %v15661_v57 }
 0x1b6   :  { %13613 = vmatpush3.xpose.msra.mxu1 %v2746_v10  ;;  %13614 = vmatprep.mubr.msk.f32.mxu1 %vm15066_vm1, %v15065_v27 }
 0x1b7   :  { %13617 = vmatprep.subr.mxu1 %v15065_v27  ;;  %v4547_v3 = vand.u32 4294901760, %v4546_v61 }
 0x1b9   :  { %13585 = vmatmul.mubr.f32.vlgmr.msra.gmra.mrb[6].mxu0 %v15537_v52  ;;  %v4548_v7 = vsub.f32 %v4546_v61, %v4547_v3 }
 0x1ba   :  { %13588 = vmatpush3.xpose.msra.mxu0 %v15546_v62  ;;  %13589 = vmatprep.mubr.msk.f32.mxu0 %vm15066_vm1, %v15065_v27 }
 0x1bb   :  { %13622 = vmatprep.subr.mxu0 %v15065_v27  ;;  %v4549_v9 = vand.u32 4294901760, %v4548_v7 }
 0x1bd   :  { %13615 = vmatmul.mubr.f32.vlgmr.msra.gmra.mrb[4].mxu1 %v15541_v54 }
 0x1be   :  { %13618 = vmatpush3.xpose.msra.mxu1 %v2668_v5  ;;  %13619 = vmatprep.mubr.msk.f32.mxu1 %vm15066_vm1, %v15065_v27 }
 0x1bf   :  { %13652 = vmatprep.subr.mxu1 %v15065_v27 }
 0x1c1   :  { %13590 = vmatmul.mubr.f32.vlgmr.msra.gmra.mrb[6].mxu0 %v15537_v52  ;;  %v15649_v52 = vand.u32 4294901760, %v4022_v48 }
 0x1c2   :  { %13623 = vmatpush3.xpose.msra.mxu0 %v15582_v21  ;;  %13624 = vmatprep.mubr.msk.f32.mxu0 %vm15066_vm1, %v15065_v27 }
 0x1c3   :  { %13627 = vmatprep.subr.mxu0 %v15065_v27  ;;  %v4093_v58 = vsub.f32 %v4022_v48, %v15649_v52 }
 0x1c5   :  { %13620 = vmatmul.mubr.f32.vlgmr.msra.gmra.mrb[4].mxu1 %v15541_v54  ;;  %13625 = vmatmul.mubr.f32.vlgmr.msra.gmra.mrb[8].mxu0 %v3190_v39  ;;  %v4094_v63 = vand.u32 4294901760, %v4093_v58 }
 0x1c6   :  { %13653 = vmatpush3.xpose.msra.mxu1 %v15589_v22  ;;  %13654 = vmatprep.mubr.msk.f32.mxu1 %vm15066_vm1, %v15065_v27 }
 0x1c7   :  { %13628 = vmatpush3.xpose.msra.mxu0 %v3201_v38  ;;  %13629 = vmatprep.mubr.msk.f32.mxu0 %vm15066_vm1, %v15065_v27  ;;  %v4095_v2 = vsub.f32 %v4093_v58, %v4094_v63 }
 0x1c8   :  { %13657 = vmatprep.subr.mxu1 %v15065_v27  ;;  %13632 = vmatprep.subr.mxu0 %v15065_v27 }
 0x1c9   :  { %13655 = vmatmul.mubr.f32.vlgmr.msra.gmra.mrb[6].mxu1 %v3643_v43  ;;  %v4474_v51 = vpop.permute.xlu1 %4473  ;;  %v4096_v6 = vand.u32 4294901760, %v4095_v2 }
 0x1ca   :  { %13658 = vmatpush3.xpose.msra.mxu1 %v3654_v41  ;;  %13659 = vmatprep.mubr.msk.f32.mxu1 %vm15066_vm1, %v15065_v27  ;;  %v4021_v46 = vpop.permute.xlu0 %4020  ;;  %v4477_v54 = vsel %vm2209_vm2, %v4474_v51, 0 }
 0x1cb   :  { %13662 = vmatprep.subr.mxu1 %v15065_v27  ;;  %v4024_v49 = vsel %vm2209_vm2, %v4021_v46, 0  ;;  %v15659_v56 = vand.u32 4294901760, %v4477_v54 }
 0x1cc   :  { %v15652_v53 = vand.u32 4294901760, %v4024_v49 }
 0x1cd   :  { %13630 = vmatmul.mubr.f32.vlgmr.msra.gmra.mrb[8].mxu0 %v15579_v20  ;;  %v15671_v60 = vsub.f32 %v4477_v54, %v15659_v56  ;;  %v5380_v17 = vpop.permute.xlu1 %5379 }
 0x1ce   :  { %13633 = vmatpush3.xpose.msra.mxu0 %v3198_v24  ;;  %13634 = vmatprep.mubr.msk.f32.mxu0 %vm15066_vm1, %v15065_v27  ;;  %v4104_v59 = vsub.f32 %v4024_v49, %v15652_v53  ;;  %v4927_v10 = vpop.permute.xlu0 %4926  ;;  %v5383_v19 = vsel %vm2209_vm2, %v5380_v17, 0 }
 0x1cf   :  { %13637 = vmatprep.subr.mxu0 %v15065_v27  ;;  %v4558_v0 = vand.u32 4294901760, %v15671_v60  ;;  %v4930_v15 = vsel %vm2209_vm2, %v4927_v10, 0 }
 0x1d0   :  { %v4105_v62 = vand.u32 4294901760, %v4104_v59  ;;  %v15723_v18 = vand.u32 4294901760, %v4930_v15 }
 0x1d1   :  { %13660 = vmatmul.mubr.f32.vlgmr.msra.gmra.mrb[6].mxu1 %v15591_v13  ;;  %v4559_v4 = vsub.f32 %v15671_v60, %v4558_v0 }
 0x1d2   :  { %13663 = vmatpush3.xpose.msra.mxu1 %v15601_v14  ;;  %13664 = vmatprep.mubr.msk.f32.mxu1 %vm15066_vm1, %v15065_v27  ;;  %v4106_v1 = vsub.f32 %v4104_v59, %v4105_v62  ;;  %v5000_v14 = vand.u32 4294901760, %v4999_v23 }
 0x1d3   :  { %13667 = vmatprep.subr.mxu1 %v15065_v27  ;;  %v4560_v8 = vand.u32 4294901760, %v4559_v4 }
 0x1d4   :  { %v4107_v5 = vand.u32 4294901760, %v4106_v1 }
 0x1d5   :  { %13635 = vmatmul.mubr.f32.vlgmr.msra.gmra.mrb[8].mxu0 %v3187_v28 }
 0x1d6   :  { %13638 = vmatpush3.xpose.msra.mxu0 %v15582_v21  ;;  %13639 = vmatprep.mubr.msk.f32.mxu0 %vm15066_vm1, %v15065_v27 }
 0x1d7   :  { %13642 = vmatprep.subr.mxu0 %v15065_v27 }
 0x1d9   :  { %13665 = vmatmul.mubr.f32.vlgmr.msra.gmra.mrb[6].mxu1 %v3640_v29 }
 0x1da   :  { %13668 = vmatpush3.xpose.msra.mxu1 %v15589_v22  ;;  %13669 = vmatprep.mubr.msk.f32.mxu1 %vm15066_vm1, %v15065_v27 }
 0x1db   :  { %13672 = vmatprep.subr.mxu1 %v15065_v27 }
 0x1dd   :  { %13640 = vmatmul.mubr.f32.vlgmr.msra.gmra.mrb[8].mxu0 %v3188_v31  ;;  %v5001_v31 = vsub.f32 %v4999_v23, %v5000_v14 }
 0x1de   :  { %13643 = vmatpush3.xpose.msra.mxu0 %v3199_v30  ;;  %13644 = vmatprep.mubr.msk.f32.mxu0 %vm15066_vm1, %v15065_v27 }
 0x1df   :  { %13647 = vmatprep.subr.mxu0 %v15065_v27 }
 0x1e1   :  { %13670 = vmatmul.mubr.f32.vlgmr.msra.gmra.mrb[6].mxu1 %v3641_v35  ;;  %v5002_v35 = vand.u32 4294901760, %v5001_v31 }
 0x1e2   :  { %13673 = vmatpush3.xpose.msra.mxu1 %v3652_v32  ;;  %13674 = vmatprep.mubr.msk.f32.mxu1 %vm15066_vm1, %v15065_v27 }
 0x1e3   :  { %13677 = vmatprep.subr.mxu1 %v15065_v27 }
 0x1e5   :  { %13645 = vmatmul.mubr.f32.vlgmr.msra.gmra.mrb[8].mxu0 %v15579_v20 }
 0x1e6   :  { %13648 = vmatpush3.xpose.msra.mxu0 %v15582_v21  ;;  %13649 = vmatprep.mubr.msk.f32.mxu0 %vm15066_vm1, %v15065_v27  ;;  %v15730_v21 = vand.u32 4294901760, %v5383_v19 }
 0x1e7   :  { %13682 = vmatprep.subr.mxu0 %v15065_v27 }
 0x1e9   :  { %13675 = vmatmul.mubr.f32.vlgmr.msra.gmra.mrb[6].mxu1 %v15591_v13 }
 0x1ea   :  { %13678 = vmatpush3.xpose.msra.mxu1 %v15589_v22  ;;  %13679 = vmatprep.mubr.msk.f32.mxu1 %vm15066_vm1, %v15065_v27  ;;  %v5010_v22 = vsub.f32 %v4930_v15, %v15723_v18 }
 0x1eb   :  { %13712 = vmatprep.subr.mxu1 %v15065_v27 }
 0x1ec   :  { %v5011_v24 = vand.u32 4294901760, %v5010_v22 }
 0x1ed   :  { %13650 = vmatmul.mubr.f32.vlgmr.msra.gmra.mrb[8].mxu0 %v15579_v20  ;;  %v5381_v20 = vsel %vm2209_vm2, %v15525_v16, 0 }
 0x1ee   :  { %13683 = vmatpush3.xpose.msra.mxu0 %v15652_v53  ;;  %13684 = vmatprep.mubr.msk.f32.mxu0 %vm15066_vm1, %v15065_v27  ;;  %v15732_v45 = vand.u32 4294901760, %v5381_v20  ;;  %v5012_v30 = vsub.f32 %v5010_v22, %v5011_v24 }
 0x1ef   :  { %13687 = vmatprep.subr.mxu0 %v15065_v27 }
 0x1f0   :  { %v5452_v28 = vsub.f32 %v5381_v20, %v15732_v45  ;;  %v5013_v34 = vand.u32 4294901760, %v5012_v30 }
 0x1f1   :  { %13680 = vmatmul.mubr.f32.vlgmr.msra.gmra.mrb[6].mxu1 %v15591_v13  ;;  %13685 = vmatmul.mubr.f32.vlgmr.msra.gmra.mrb[10].mxu0 %v4096_v6  ;;  %v5463_v13 = vsub.f32 %v5383_v19, %v15730_v21 }
 0x1f2   :  { %13713 = vmatpush3.xpose.msra.mxu1 %v15659_v56  ;;  %13714 = vmatprep.mubr.msk.f32.mxu1 %vm15066_vm1, %v15065_v27  ;;  %v5453_v32 = vand.u32 4294901760, %v5452_v28 }
 0x1f3   :  { %13688 = vmatpush3.xpose.msra.mxu0 %v4107_v5  ;;  %13689 = vmatprep.mubr.msk.f32.mxu0 %vm15066_vm1, %v15065_v27  ;;  %v5464_v29 = vand.u32 4294901760, %v5463_v13 }
 0x1f4   :  { %13717 = vmatprep.subr.mxu1 %v15065_v27  ;;  %13692 = vmatprep.subr.mxu0 %v15065_v27  ;;  %v5454_v37 = vsub.f32 %v5452_v28, %v5453_v32 }
 0x1f5   :  { %13715 = vmatmul.mubr.f32.vlgmr.msra.gmra.mrb[8].mxu1 %v4549_v9  ;;  %v5465_v33 = vsub.f32 %v5463_v13, %v5464_v29 }
 0x1f6   :  { %13718 = vmatpush3.xpose.msra.mxu1 %v4560_v8  ;;  %13719 = vmatprep.mubr.msk.f32.mxu1 %vm15066_vm1, %v15065_v27  ;;  %v5455_v39 = vand.u32 4294901760, %v5454_v37 }
 0x1f7   :  { %13722 = vmatprep.subr.mxu1 %v15065_v27  ;;  %v5466_v38 = vand.u32 4294901760, %v5465_v33 }
 0x1f9   :  { %13690 = vmatmul.mubr.f32.vlgmr.msra.gmra.mrb[10].mxu0 %v15649_v52 }
 0x1fa   :  { %13693 = vmatpush3.xpose.msra.mxu0 %v4104_v59  ;;  %13694 = vmatprep.mubr.msk.f32.mxu0 %vm15066_vm1, %v15065_v27 }
 0x1fb   :  { %13697 = vmatprep.subr.mxu0 %v15065_v27 }
 0x1fd   :  { %13720 = vmatmul.mubr.f32.vlgmr.msra.gmra.mrb[8].mxu1 %v15661_v57 }
 0x1fe   :  { %13723 = vmatpush3.xpose.msra.mxu1 %v15671_v60  ;;  %13724 = vmatprep.mubr.msk.f32.mxu1 %vm15066_vm1, %v15065_v27 }
 0x1ff   :  { %13727 = vmatprep.subr.mxu1 %v15065_v27 }
 0x201   :  { %13695 = vmatmul.mubr.f32.vlgmr.msra.gmra.mrb[10].mxu0 %v4093_v58 }
 0x202   :  { %13698 = vmatpush3.xpose.msra.mxu0 %v15652_v53  ;;  %13699 = vmatprep.mubr.msk.f32.mxu0 %vm15066_vm1, %v15065_v27 }
 0x203   :  { %13702 = vmatprep.subr.mxu0 %v15065_v27 }
 0x205   :  { %13725 = vmatmul.mubr.f32.vlgmr.msra.gmra.mrb[8].mxu1 %v4546_v61 }
 0x206   :  { %13728 = vmatpush3.xpose.msra.mxu1 %v15659_v56  ;;  %13729 = vmatprep.mubr.msk.f32.mxu1 %vm15066_vm1, %v15065_v27 }
 0x207   :  { %13732 = vmatprep.subr.mxu1 %v15065_v27 }
 0x209   :  { %13700 = vmatmul.mubr.f32.vlgmr.msra.gmra.mrb[10].mxu0 %v4094_v63 }
 0x20a   :  { %13703 = vmatpush3.xpose.msra.mxu0 %v4105_v62  ;;  %13704 = vmatprep.mubr.msk.f32.mxu0 %vm15066_vm1, %v15065_v27 }
 0x20b   :  { %13707 = vmatprep.subr.mxu0 %v15065_v27 }
 0x20d   :  { %13730 = vmatmul.mubr.f32.vlgmr.msra.gmra.mrb[8].mxu1 %v4547_v3 }
 0x20e   :  { %13733 = vmatpush3.xpose.msra.mxu1 %v4558_v0  ;;  %13734 = vmatprep.mubr.msk.f32.mxu1 %vm15066_vm1, %v15065_v27 }
 0x20f   :  { %13737 = vmatprep.subr.mxu1 %v15065_v27 }
 0x211   :  { %13705 = vmatmul.mubr.f32.vlgmr.msra.gmra.mrb[10].mxu0 %v15649_v52 }
 0x212   :  { %13708 = vmatpush3.xpose.msra.mxu0 %v15652_v53  ;;  %13709 = vmatprep.mubr.msk.f32.mxu0 %vm15066_vm1, %v15065_v27 }
 0x213   :  { %13742 = vmatprep.subr.mxu0 %v15065_v27 }
 0x215   :  { %13735 = vmatmul.mubr.f32.vlgmr.msra.gmra.mrb[8].mxu1 %v15661_v57 }
 0x216   :  { %13738 = vmatpush3.xpose.msra.mxu1 %v15659_v56  ;;  %13739 = vmatprep.mubr.msk.f32.mxu1 %vm15066_vm1, %v15065_v27 }
 0x217   :  { %13772 = vmatprep.subr.mxu1 %v15065_v27 }
 0x219   :  { %13710 = vmatmul.mubr.f32.vlgmr.msra.gmra.mrb[10].mxu0 %v15649_v52 }
 0x21a   :  { %13743 = vmatpush3.xpose.msra.mxu0 %v15723_v18  ;;  %13744 = vmatprep.mubr.msk.f32.mxu0 %vm15066_vm1, %v15065_v27 }
 0x21b   :  { %13747 = vmatprep.subr.mxu0 %v15065_v27 }
 0x21d   :  { %13740 = vmatmul.mubr.f32.vlgmr.msra.gmra.mrb[8].mxu1 %v15661_v57  ;;  %13745 = vmatmul.mubr.f32.vlgmr.msra.gmra.mrb[12].mxu0 %v5002_v35 }
 0x21e   :  { %13773 = vmatpush3.xpose.msra.mxu1 %v15730_v21  ;;  %13774 = vmatprep.mubr.msk.f32.mxu1 %vm15066_vm1, %v15065_v27 }
 0x21f   :  { %13748 = vmatpush3.xpose.msra.mxu0 %v5013_v34  ;;  %13749 = vmatprep.mubr.msk.f32.mxu0 %vm15066_vm1, %v15065_v27 }
 0x220   :  { %13777 = vmatprep.subr.mxu1 %v15065_v27  ;;  %13752 = vmatprep.subr.mxu0 %v15065_v27 }
 0x221   :  { %13775 = vmatmul.mubr.f32.vlgmr.msra.gmra.mrb[10].mxu1 %v5455_v39 }
 0x222   :  { %13778 = vmatpush3.xpose.msra.mxu1 %v5466_v38  ;;  %13779 = vmatprep.mubr.msk.f32.mxu1 %vm15066_vm1, %v15065_v27 }
 0x223   :  { %13782 = vmatprep.subr.mxu1 %v15065_v27 }
 0x225   :  { %13750 = vmatmul.mubr.f32.vlgmr.msra.gmra.mrb[12].mxu0 %v15720_v44 }
 0x226   :  { %13753 = vmatpush3.xpose.msra.mxu0 %v5010_v22  ;;  %13754 = vmatprep.mubr.msk.f32.mxu0 %vm15066_vm1, %v15065_v27 }
 0x227   :  { %13757 = vmatprep.subr.mxu0 %v15065_v27 }
 0x229   :  { %13780 = vmatmul.mubr.f32.vlgmr.msra.gmra.mrb[10].mxu1 %v15732_v45 }
 0x22a   :  { %13783 = vmatpush3.xpose.msra.mxu1 %v5463_v13  ;;  %13784 = vmatprep.mubr.msk.f32.mxu1 %vm15066_vm1, %v15065_v27 }
 0x22b   :  { %13787 = vmatprep.subr.mxu1 %v15065_v27 }
 0x22d   :  { %13755 = vmatmul.mubr.f32.vlgmr.msra.gmra.mrb[12].mxu0 %v4999_v23 }
 0x22e   :  { %13758 = vmatpush3.xpose.msra.mxu0 %v15723_v18  ;;  %13759 = vmatprep.mubr.msk.f32.mxu0 %vm15066_vm1, %v15065_v27 }
 0x22f   :  { %13762 = vmatprep.subr.mxu0 %v15065_v27 }
 0x231   :  { %13785 = vmatmul.mubr.f32.vlgmr.msra.gmra.mrb[10].mxu1 %v5452_v28 }
 0x232   :  { %13788 = vmatpush3.xpose.msra.mxu1 %v15730_v21  ;;  %13789 = vmatprep.mubr.msk.f32.mxu1 %vm15066_vm1, %v15065_v27 }
 0x233   :  { %13792 = vmatprep.subr.mxu1 %v15065_v27 }
 0x235   :  { %13760 = vmatmul.mubr.f32.vlgmr.msra.gmra.mrb[12].mxu0 %v5000_v14 }
 0x236   :  { %13763 = vmatpush3.xpose.msra.mxu0 %v5011_v24  ;;  %13764 = vmatprep.mubr.msk.f32.mxu0 %vm15066_vm1, %v15065_v27 }
 0x237   :  { %13767 = vmatprep.subr.mxu0 %v15065_v27 }
 0x239   :  { %13790 = vmatmul.mubr.f32.vlgmr.msra.gmra.mrb[10].mxu1 %v5453_v32 }
 0x23a   :  { %13793 = vmatpush3.xpose.msra.mxu1 %v5464_v29  ;;  %13794 = vmatprep.mubr.msk.f32.mxu1 %vm15066_vm1, %v15065_v27 }
 0x23b   :  { %13797 = vmatprep.subr.mxu1 %v15065_v27 }
 0x23d   :  { %13765 = vmatmul.mubr.f32.vlgmr.msra.gmra.mrb[12].mxu0 %v15720_v44 }
 0x23e   :  { %13768 = vmatpush3.xpose.msra.mxu0 %v15723_v18  ;;  %13769 = vmatprep.mubr.msk.f32.mxu0 %vm15066_vm1, %v15065_v27 }
 0x23f   :  { %13802 = vmatprep.subr.mxu0 %v15065_v27 }
 0x241   :  { %13795 = vmatmul.mubr.f32.vlgmr.msra.gmra.mrb[10].mxu1 %v15732_v45 }
 0x242   :  { %13798 = vmatpush3.xpose.msra.mxu1 %v15730_v21  ;;  %13799 = vmatprep.mubr.msk.f32.mxu1 %vm15066_vm1, %v15065_v27 }
 0x243   :  { %13832 = vmatprep.subr.mxu1 %v15065_v27 }
 0x245   :  { %13770 = vmatmul.mubr.f32.vlgmr.msra.gmra.mrb[12].mxu0 %v15720_v44 }
 0x246   :  { %13804 = vmatprep.mubr.msk.f32.mxu0 %vm15066_vm1, %v15065_v27 }
 0x249   :  { %13800 = vmatmul.mubr.f32.vlgmr.msra.gmra.mrb[10].mxu1 %v15732_v45 }
 0x24a   :  { %13834 = vmatprep.mubr.msk.f32.mxu1 %vm15066_vm1, %v15065_v27 }
 0x294   :  { %v2656_v40 = vpop.f32.mrb[6].mxu0 }
 0x295   :  { %v5831_v41 = vmul.f32 0.35355338, %v2656_v40  ;;  %v13591_v43 = vpop.f32.mrb[7].mxu0 }
 0x297   :  { %v5839_v46 = vsel %vm2209_vm2, %v5831_v41, -inf }
 0x298   :  { %v3109_v48 = vpop.f32.mrb[4].mxu1  ;;  %5840 = vmax.xlane.f32.xlu0 %v5839_v46 }
 0x299   :  { %v5832_v49 = vmul.f32 0.35355338, %v3109_v48  ;;  %v13621_v51 = vpop.f32.mrb[5].mxu1 }
 0x29b   :  { %v5842_v52 = vsel %vm2209_vm2, %v5832_v49, -inf }
 0x29c   :  { %5843 = vmax.xlane.f32.xlu1 %v5842_v52 }
 0x2c0   :  { %v3562_v53 = vpop.f32.mrb[8].mxu0 }
 0x2c1   :  { %v5833_v54 = vmul.f32 0.35355338, %v3562_v53  ;;  %v13651_v55 = vpop.f32.mrb[9].mxu0 }
 0x2c3   :  { %v5845_v56 = vsel %vm2209_vm2, %v5833_v54, -inf }
 0x2c4   :  { %v4015_v57 = vpop.f32.mrb[6].mxu1  ;;  %5846 = vmax.xlane.f32.xlu0 %v5845_v56 }
 0x2c5   :  { %v5834_v58 = vmul.f32 0.35355338, %v4015_v57  ;;  %v13681_v59 = vpop.f32.mrb[7].mxu1 }
 0x2c7   :  { %v5848_v60 = vsel %vm2209_vm2, %v5834_v58, -inf }
 0x2c8   :  { %5849 = vmax.xlane.f32.xlu0 %v5848_v60 }
 0x2ec   :  { %v4468_v61 = vpop.f32.mrb[10].mxu0 }
 0x2ed   :  { %v5835_v62 = vmul.f32 0.35355338, %v4468_v61  ;;  %v13711_v63 = vpop.f32.mrb[11].mxu0 }
 0x2ef   :  { %v5851_v0 = vsel %vm2209_vm2, %v5835_v62, -inf }
 0x2f0   :  { %v4921_v1 = vpop.f32.mrb[8].mxu1  ;;  %5852 = vmax.xlane.f32.xlu1 %v5851_v0 }
 0x2f1   :  { %v5836_v2 = vmul.f32 0.35355338, %v4921_v1  ;;  %v13741_v3 = vpop.f32.mrb[9].mxu1 }
 0x2f3   :  { %v5854_v4 = vsel %vm2209_vm2, %v5836_v2, -inf }
 0x2f4   :  { %5855 = vmax.xlane.f32.xlu0 %v5854_v4 }
 0x318   :  { %v5374_v5 = vpop.f32.mrb[12].mxu0 }
 0x319   :  { %v13771_v6 = vpop.f32.mrb[13].mxu0  ;;  %v15815_v14 = vmul.f32 0.35355338, %v5374_v5 }
 0x31b   :  { %v5857_v30 = vsel %vm2209_vm2, %v15815_v14, -inf }
 0x31c   :  { %v5827_v7 = vpop.f32.mrb[10].mxu1 }
 0x31d   :  { %v13801_v8 = vpop.f32.mrb[11].mxu1  ;;  %v15817_v29 = vmul.f32 0.35355338, %v5827_v7 }
 0x325   :  { %v5841_v9 = vpop.xlane.xlu0 %5840 }
 0x326   :  { %v5863_v10 = vsub.f32 %v5831_v41, %v5841_v9 }
 0x328   :  { %v5871_v11 = vmul.f32 1.442695, %v5863_v10 }
 0x329   :  { %v5844_v15 = vpop.xlane.xlu1 %5843 }
 0x32a   :  { %14964 = vpow2.f32 %v5871_v11  ;;  %v5864_v17 = vsub.f32 %v5832_v49, %v5844_v15 }
 0x32c   :  { %v5873_v44 = vmul.f32 1.442695, %v5864_v17 }
 0x32e   :  { %14966 = vpow2.f32 %v5873_v44 }
 0x334   :  { %v14965_v18 = vpop.eup %14964 }
 0x335   :  { %v5887_v19 = vsel %vm2209_vm2, %v14965_v18, 0.0 }
 0x336   :  { %5888 = vadd.xlane.f32.xlu1 %v5887_v19 }
 0x338   :  { %v14967_v20 = vpop.eup %14966 }
 0x339   :  { %v5890_v21 = vsel %vm2209_vm2, %v14967_v20, 0.0 }
 0x33a   :  { %5891 = vadd.xlane.f32.xlu0 %v5890_v21 }
 0x347   :  { %5927 = vrot.lane.b32.xlu1 %v15482_v25, %s15068_s2  ;;  %v5860_v25 = vsel %vm2209_vm2, %v15817_v29, -inf }
 0x350   :  { %6379 = vrot.lane.b32.xlu0 %v15489_v26, %s15068_s2 }
 0x351   :  { %v5847_v45 = vpop.xlane.xlu0 %5846 }
 0x352   :  { %v5865_v23 = vsub.f32 %v5833_v54, %v5847_v45 }
 0x354   :  { %v5875_v13 = vmul.f32 1.442695, %v5865_v23 }
 0x355   :  { %v5850_v22 = vpop.xlane.xlu0 %5849 }
 0x356   :  { %v5866_v28 = vsub.f32 %v5834_v58, %v5850_v22  ;;  %14968 = vpow2.f32 %v5875_v13 }
 0x358   :  { %v5877_v24 = vmul.f32 1.442695, %v5866_v28 }
 0x35a   :  { %14970 = vpow2.f32 %v5877_v24 }
 0x360   :  { %v15821_v31 = vpop.eup %14968 }
 0x361   :  { %v5893_v26 = vsel %vm2209_vm2, %v15821_v31, 0.0 }
 0x364   :  { %v15827_v32 = vpop.eup %14970 }
 0x365   :  { %v5896_v33 = vsel %vm2209_vm2, %v15827_v32, 0.0 }
 0x36b   :  { %5858 = vmax.xlane.f32.xlu1 %v5857_v30 }
 0x36f   :  { %5861 = vmax.xlane.f32.xlu0 %v5860_v25  ;;  %5894 = vadd.xlane.f32.xlu1 %v5893_v26 }
 0x373   :  { %5897 = vadd.xlane.f32.xlu0 %v5896_v33 }
 0x37d   :  { %v5853_v34 = vpop.xlane.xlu1 %5852 }
 0x37e   :  { %v5867_v35 = vsub.f32 %v5835_v62, %v5853_v34 }
 0x380   :  { %6831 = vrot.lane.b32.xlu1 %v15501_v12, %s15068_s2  ;;  %v5879_v38 = vmul.f32 1.442695, %v5867_v35 }
 0x381   :  { %v5856_v37 = vpop.xlane.xlu0 %5855 }
 0x382   :  { %v5868_v39 = vsub.f32 %v5836_v2, %v5856_v37  ;;  %14972 = vpow2.f32 %v5879_v38 }
 0x384   :  { %v5881_v40 = vmul.f32 1.442695, %v5868_v39 }
 0x386   :  { %14974 = vpow2.f32 %v5881_v40 }
 0x389   :  { %7283 = vrot.lane.b32.xlu0 %v15499_v36, %s15068_s2 }
 0x38c   :  { %v15835_v41 = vpop.eup %14972 }
 0x38d   :  { %v5899_v43 = vsel %vm2209_vm2, %v15835_v41, 0.0 }
 0x390   :  { %v15839_v46 = vpop.eup %14974 }
 0x391   :  { %v5902_v12 = vsel %vm2209_vm2, %v15839_v46, 0.0 }
 0x3a4   :  { %5900 = vadd.xlane.f32.xlu1 %v5899_v43 }
 0x3a8   :  { %5903 = vadd.xlane.f32.xlu0 %v5902_v12 }
 0x3b5   :  { %7735 = vrot.lane.b32.xlu1 %v15521_v47, %s15068_s2 }
 0x3be   :  { %8187 = vrot.lane.b32.xlu0 %v15516_v42, %s15068_s2 }
 0x3c3   :  { %v5889_v36 = vpop.xlane.xlu1 %5888 }
 0x3c4   :  { %14976 = vrcp.f32 %v5889_v36 }
 0x3c7   :  { %v5892_v48 = vpop.xlane.xlu0 %5891  ;;  %v5928_v49 = vpop.permute.xlu1 %5927 }
 0x3c8   :  { %14978 = vrcp.f32 %v5892_v48  ;;  %v15847_v51 = vand.u32 4294901760, %v5928_v49 }
 0x3ca   :  { %13803 = vmatpush3.msra.mxu0 %v15847_v51  ;;  %v6011_v42 = vsub.f32 %v5928_v49, %v15847_v51 }
 0x3cb   :  { %v6380_v52 = vpop.permute.xlu0 %6379  ;;  %13807 = vmatprep.subr.mxu0 %v15065_v27 }
 0x3cc   :  { %v15851_v53 = vand.u32 4294901760, %v6380_v52  ;;  %v6012_v59 = vand.u32 4294901760, %v6011_v42 }
 0x3ce   :  { %v14977_v54 = vpop.eup %14976  ;;  %13833 = vmatpush3.msra.mxu1 %v15851_v53  ;;  %v6463_v60 = vsub.f32 %v6380_v52, %v15851_v53  ;;  %v6013_v1 = vsub.f32 %v6011_v42, %v6012_v59 }
 0x3cf   :  { %v5912_v47 = vmul.f32 %v14977_v54, %v14965_v18  ;;  %13837 = vmatprep.subr.mxu1 %v15065_v27 }
 0x3d0   :  { %v6464_v2 = vand.u32 4294901760, %v6463_v60  ;;  %v6014_v7 = vand.u32 4294901760, %v6013_v1 }
 0x3d1   :  { %v5931_v55 = vsel %vm2209_vm2, %v5912_v47, 0 }
 0x3d2   :  { %v14979_v56 = vpop.eup %14978  ;;  %v15857_v57 = vand.u32 4294901760, %v5931_v55  ;;  %v6465_v8 = vsub.f32 %v6463_v60, %v6464_v2 }
 0x3d3   :  { %v5914_v58 = vmul.f32 %v14979_v56, %v14967_v20 }
 0x3d4   :  { %v6000_v61 = vsub.f32 %v5931_v55, %v15857_v57  ;;  %v6466_v11 = vand.u32 4294901760, %v6465_v8 }
 0x3d5   :  { %v6383_v62 = vsel %vm2209_vm2, %v5914_v58, 0 }
 0x3d6   :  { %v6001_v63 = vand.u32 4294901760, %v6000_v61  ;;  %v15862_v0 = vand.u32 4294901760, %v6383_v62 }
 0x3d8   :  { %v6002_v3 = vsub.f32 %v6000_v61, %v6001_v63  ;;  %v6452_v4 = vsub.f32 %v6383_v62, %v15862_v0 }
 0x3da   :  { %v6003_v5 = vand.u32 4294901760, %v6002_v3  ;;  %v6453_v6 = vand.u32 4294901760, %v6452_v4 }
 0x3dc   :  { %13805 = vmatmul.mubr.f32.vlgmr.msra.gmra.mrb[14].mxu0 %v6003_v5  ;;  %v6454_v9 = vsub.f32 %v6452_v4, %v6453_v6 }
 0x3dd   :  { %13808 = vmatpush3.msra.mxu0 %v6014_v7  ;;  %13809 = vmatprep.mubr.msk.f32.mxu0 %vm15066_vm1, %v15065_v27 }
 0x3de   :  { %v6455_v10 = vand.u32 4294901760, %v6454_v9  ;;  %13812 = vmatprep.subr.mxu0 %v15065_v27 }
 0x3e0   :  { %13835 = vmatmul.mubr.f32.vlgmr.msra.gmra.mrb[12].mxu1 %v6455_v10 }
 0x3e1   :  { %13838 = vmatpush3.msra.mxu1 %v6466_v11  ;;  %13839 = vmatprep.mubr.msk.f32.mxu1 %vm15066_vm1, %v15065_v27 }
 0x3e2   :  { %13842 = vmatprep.subr.mxu1 %v15065_v27 }
 0x3e4   :  { %13810 = vmatmul.mubr.f32.vlgmr.msra.gmra.mrb[14].mxu0 %v15857_v57 }
 0x3e5   :  { %13813 = vmatpush3.msra.mxu0 %v6011_v42  ;;  %13814 = vmatprep.mubr.msk.f32.mxu0 %vm15066_vm1, %v15065_v27 }
 0x3e6   :  { %13817 = vmatprep.subr.mxu0 %v15065_v27 }
 0x3e8   :  { %13840 = vmatmul.mubr.f32.vlgmr.msra.gmra.mrb[12].mxu1 %v15862_v0 }
 0x3e9   :  { %13843 = vmatpush3.msra.mxu1 %v6463_v60  ;;  %13844 = vmatprep.mubr.msk.f32.mxu1 %vm15066_vm1, %v15065_v27 }
 0x3ea   :  { %13847 = vmatprep.subr.mxu1 %v15065_v27 }
 0x3ec   :  { %13815 = vmatmul.mubr.f32.vlgmr.msra.gmra.mrb[14].mxu0 %v6000_v61 }
 0x3ed   :  { %13818 = vmatpush3.msra.mxu0 %v15847_v51  ;;  %13819 = vmatprep.mubr.msk.f32.mxu0 %vm15066_vm1, %v15065_v27 }
 0x3ee   :  { %13822 = vmatprep.subr.mxu0 %v15065_v27 }
 0x3f0   :  { %13845 = vmatmul.mubr.f32.vlgmr.msra.gmra.mrb[12].mxu1 %v6452_v4 }
 0x3f1   :  { %13848 = vmatpush3.msra.mxu1 %v15851_v53  ;;  %13849 = vmatprep.mubr.msk.f32.mxu1 %vm15066_vm1, %v15065_v27 }
 0x3f2   :  { %13852 = vmatprep.subr.mxu1 %v15065_v27 }
 0x3f4   :  { %13820 = vmatmul.mubr.f32.vlgmr.msra.gmra.mrb[14].mxu0 %v6001_v63 }
 0x3f5   :  { %13823 = vmatpush3.msra.mxu0 %v6012_v59  ;;  %13824 = vmatprep.mubr.msk.f32.mxu0 %vm15066_vm1, %v15065_v27 }
 0x3f6   :  { %13827 = vmatprep.subr.mxu0 %v15065_v27 }
 0x3f8   :  { %13850 = vmatmul.mubr.f32.vlgmr.msra.gmra.mrb[12].mxu1 %v6453_v6  ;;  %v5859_v15 = vpop.xlane.xlu1 %5858 }
 0x3f9   :  { %13853 = vmatpush3.msra.mxu1 %v6464_v2  ;;  %v5869_v17 = vsub.f32 %v15815_v14, %v5859_v15  ;;  %13854 = vmatprep.mubr.msk.f32.mxu1 %vm15066_vm1, %v15065_v27 }
 0x3fa   :  { %13857 = vmatprep.subr.mxu1 %v15065_v27 }
 0x3fb   :  { %v5883_v44 = vmul.f32 1.442695, %v5869_v17 }
 0x3fc   :  { %v5862_v18 = vpop.xlane.xlu0 %5861  ;;  %13825 = vmatmul.mubr.f32.vlgmr.msra.gmra.mrb[14].mxu0 %v15857_v57  ;;  %v5895_v19 = vpop.xlane.xlu1 %5894 }
 0x3fd   :  { %14980 = vpow2.f32 %v5883_v44  ;;  %v5870_v20 = vsub.f32 %v15817_v29, %v5862_v18  ;;  %13828 = vmatpush3.msra.mxu0 %v15847_v51  ;;  %13829 = vmatprep.mubr.msk.f32.mxu0 %vm15066_vm1, %v15065_v27 }
 0x3fe   :  { %14982 = vrcp.f32 %v5895_v19  ;;  %13862 = vmatprep.subr.mxu0 %v15065_v27 }
 0x3ff   :  { %v5885_v21 = vmul.f32 1.442695, %v5870_v20 }
 0x400   :  { %13855 = vmatmul.mubr.f32.vlgmr.msra.gmra.mrb[12].mxu1 %v15862_v0  ;;  %v5898_v45 = vpop.xlane.xlu0 %5897  ;;  %v6832_v23 = vpop.permute.xlu1 %6831 }
 0x401   :  { %14984 = vpow2.f32 %v5885_v21  ;;  %13858 = vmatpush3.msra.mxu1 %v15851_v53  ;;  %v15902_v22 = vand.u32 4294901760, %v6832_v23  ;;  %13859 = vmatprep.mubr.msk.f32.mxu1 %vm15066_vm1, %v15065_v27 }
 0x402   :  { %14986 = vrcp.f32 %v5898_v45  ;;  %13892 = vmatprep.subr.mxu1 %v15065_v27 }
 0x403   :  { %v6915_v25 = vsub.f32 %v6832_v23, %v15902_v22 }
 0x404   :  { %v7284_v13 = vpop.permute.xlu0 %7283  ;;  %13830 = vmatmul.mubr.f32.vlgmr.msra.gmra.mrb[14].mxu0 %v15857_v57 }
 0x405   :  { %v15908_v28 = vand.u32 4294901760, %v7284_v13  ;;  %13863 = vmatpush3.msra.mxu0 %v15902_v22  ;;  %13864 = vmatprep.mubr.msk.f32.mxu0 %vm15066_vm1, %v15065_v27  ;;  %v6916_v38 = vand.u32 4294901760, %v6915_v25 }
 0x406   :  { %13867 = vmatprep.subr.mxu0 %v15065_v27 }
 0x407   :  { %v15914_v24 = vpop.eup %14980  ;;  %v7367_v39 = vsub.f32 %v7284_v13, %v15908_v28  ;;  %v6917_v48 = vsub.f32 %v6915_v25, %v6916_v38 }
 0x408   :  { %v14983_v14 = vpop.eup %14982  ;;  %13860 = vmatmul.mubr.f32.vlgmr.msra.gmra.mrb[12].mxu1 %v15862_v0  ;;  %v5905_v29 = vsel %vm2209_vm2, %v15914_v24, 0.0 }
 0x409   :  { %v5916_v30 = vmul.f32 %v14983_v14, %v15821_v31  ;;  %13893 = vmatpush3.msra.mxu1 %v15908_v28  ;;  %5906 = vadd.xlane.f32.xlu1 %v5905_v29  ;;  %v7368_v49 = vand.u32 4294901760, %v7367_v39  ;;  %v6918_v47 = vand.u32 4294901760, %v6917_v48 }
 0x40a   :  { %13894 = vmatprep.mubr.msk.f32.mxu1 %vm15066_vm1, %v15065_v27  ;;  %13897 = vmatprep.subr.mxu1 %v15065_v27 }
 0x40b   :  { %v15925_v26 = vpop.eup %14984  ;;  %v6835_v33 = vsel %vm2209_vm2, %v5916_v30, 0 }
 0x40c   :  { %v14987_v34 = vpop.eup %14986  ;;  %v5908_v35 = vsel %vm2209_vm2, %v15925_v26, 0.0  ;;  %v15930_v37 = vand.u32 4294901760, %v6835_v33 }
 0x40d   :  { %v5918_v31 = vmul.f32 %v14987_v34, %v15827_v32  ;;  %5909 = vadd.xlane.f32.xlu0 %v5908_v35  ;;  %v7369_v32 = vsub.f32 %v7367_v39, %v7368_v49 }
 0x40e   :  { %v6904_v40 = vsub.f32 %v6835_v33, %v15930_v37 }
 0x40f   :  { %v7287_v43 = vsel %vm2209_vm2, %v5918_v31, 0  ;;  %v7370_v56 = vand.u32 4294901760, %v7369_v32 }
 0x410   :  { %v6905_v12 = vand.u32 4294901760, %v6904_v40  ;;  %v15936_v36 = vand.u32 4294901760, %v7287_v43 }
 0x412   :  { %v6906_v51 = vsub.f32 %v6904_v40, %v6905_v12  ;;  %v7356_v52 = vsub.f32 %v7287_v43, %v15936_v36 }
 0x414   :  { %v6907_v53 = vand.u32 4294901760, %v6906_v51  ;;  %v7357_v54 = vand.u32 4294901760, %v7356_v52 }
 0x416   :  { %13865 = vmatmul.mubr.f32.vlgmr.msra.gmra.mrb[16].mxu0 %v6907_v53  ;;  %v7358_v42 = vsub.f32 %v7356_v52, %v7357_v54 }
 0x417   :  { %13868 = vmatpush3.msra.mxu0 %v6918_v47  ;;  %13869 = vmatprep.mubr.msk.f32.mxu0 %vm15066_vm1, %v15065_v27 }
 0x418   :  { %v7359_v55 = vand.u32 4294901760, %v7358_v42  ;;  %13872 = vmatprep.subr.mxu0 %v15065_v27  ;;  %v9543_v42 = vld [vmem:[%s16345_s3] sm:$0xff] }
 0x41a   :  { %13895 = vmatmul.mubr.f32.vlgmr.msra.gmra.mrb[14].mxu1 %v7359_v55  ;;  %8639 = vrot.lane.b32.xlu1 %v15529_v50, %s15068_s2  ;;  %v9554_v55 = vand.u32 4294901760, %v9543_v42 }
 0x41b   :  { %13898 = vmatpush3.msra.mxu1 %v7370_v56  ;;  %13899 = vmatprep.mubr.msk.f32.mxu1 %vm15066_vm1, %v15065_v27 }
 0x41c   :  { %13902 = vmatprep.subr.mxu1 %v15065_v27  ;;  %v9641_v56 = vsub.f32 %v9543_v42, %v9554_v55 }
 0x41e   :  { %13870 = vmatmul.mubr.f32.vlgmr.msra.gmra.mrb[16].mxu0 %v15930_v37 }
 0x41f   :  { %13873 = vmatpush3.msra.mxu0 %v6915_v25  ;;  %13874 = vmatprep.mubr.msk.f32.mxu0 %vm15066_vm1, %v15065_v27 }
 0x420   :  { %13877 = vmatprep.subr.mxu0 %v15065_v27 }
 0x422   :  { %13900 = vmatmul.mubr.f32.vlgmr.msra.gmra.mrb[14].mxu1 %v15936_v36 }
 0x423   :  { %13903 = vmatpush3.msra.mxu1 %v7367_v39  ;;  %9091 = vrot.lane.b32.xlu0 %v15525_v16, %s15068_s2 }
 0x424   :  { %13904 = vmatprep.mubr.msk.f32.mxu1 %vm15066_vm1, %v15065_v27  ;;  %13907 = vmatprep.subr.mxu1 %v15065_v27 }
 0x426   :  { %13875 = vmatmul.mubr.f32.vlgmr.msra.gmra.mrb[16].mxu0 %v6904_v40 }
 0x427   :  { %13878 = vmatpush3.msra.mxu0 %v15902_v22  ;;  %13879 = vmatprep.mubr.msk.f32.mxu0 %vm15066_vm1, %v15065_v27 }
 0x428   :  { %13882 = vmatprep.subr.mxu0 %v15065_v27 }
 0x42a   :  { %13905 = vmatmul.mubr.f32.vlgmr.msra.gmra.mrb[14].mxu1 %v7356_v52 }
 0x42b   :  { %13908 = vmatpush3.msra.mxu1 %v15908_v28  ;;  %13909 = vmatprep.mubr.msk.f32.mxu1 %vm15066_vm1, %v15065_v27 }
 0x42c   :  { %13912 = vmatprep.subr.mxu1 %v15065_v27 }
 0x42e   :  { %13880 = vmatmul.mubr.f32.vlgmr.msra.gmra.mrb[16].mxu0 %v6905_v12 }
 0x42f   :  { %13883 = vmatpush3.msra.mxu0 %v6916_v38  ;;  %13884 = vmatprep.mubr.msk.f32.mxu0 %vm15066_vm1, %v15065_v27 }
 0x430   :  { %13887 = vmatprep.subr.mxu0 %v15065_v27 }
 0x431   :  { %v5901_v16 = vpop.xlane.xlu1 %5900 }
 0x432   :  { %13910 = vmatmul.mubr.f32.vlgmr.msra.gmra.mrb[14].mxu1 %v7357_v54  ;;  %14988 = vrcp.f32 %v5901_v16  ;;  %v9642_v16 = vand.u32 4294901760, %v9641_v56 }
 0x433   :  { %13913 = vmatpush3.msra.mxu1 %v7368_v49  ;;  %13914 = vmatprep.mubr.msk.f32.mxu1 %vm15066_vm1, %v15065_v27 }
 0x434   :  { %13917 = vmatprep.subr.mxu1 %v15065_v27 }
 0x435   :  { %v5904_v50 = vpop.xlane.xlu0 %5903  ;;  %v7736_v57 = vpop.permute.xlu1 %7735 }
 0x436   :  { %14990 = vrcp.f32 %v5904_v50  ;;  %13885 = vmatmul.mubr.f32.vlgmr.msra.gmra.mrb[16].mxu0 %v15930_v37  ;;  %v15976_v58 = vand.u32 4294901760, %v7736_v57  ;;  %v9643_v50 = vsub.f32 %v9641_v56, %v9642_v16 }
 0x437   :  { %13888 = vmatpush3.msra.mxu0 %v15902_v22  ;;  %13889 = vmatprep.mubr.msk.f32.mxu0 %vm15066_vm1, %v15065_v27 }
 0x438   :  { %13922 = vmatprep.subr.mxu0 %v15065_v27  ;;  %v7819_v62 = vsub.f32 %v7736_v57, %v15976_v58  ;;  %v9644_v57 = vand.u32 4294901760, %v9643_v50 }
 0x439   :  { %v8188_v59 = vpop.permute.xlu0 %8187 }
 0x43a   :  { %13915 = vmatmul.mubr.f32.vlgmr.msra.gmra.mrb[14].mxu1 %v15936_v36  ;;  %v15985_v63 = vand.u32 4294901760, %v8188_v59 }
 0x43b   :  { %13918 = vmatpush3.msra.mxu1 %v15908_v28  ;;  %13919 = vmatprep.mubr.msk.f32.mxu1 %vm15066_vm1, %v15065_v27 }
 0x43c   :  { %v14989_v60 = vpop.eup %14988  ;;  %13952 = vmatprep.subr.mxu1 %v15065_v27  ;;  %v8271_v4 = vsub.f32 %v8188_v59, %v15985_v63 }
 0x43d   :  { %v5920_v61 = vmul.f32 %v14989_v60, %v15835_v41  ;;  %v7820_v41 = vand.u32 4294901760, %v7819_v62 }
 0x43e   :  { %13890 = vmatmul.mubr.f32.vlgmr.msra.gmra.mrb[16].mxu0 %v15930_v37  ;;  %v8272_v10 = vand.u32 4294901760, %v8271_v4 }
 0x43f   :  { %13923 = vmatpush3.msra.mxu0 %v15976_v58  ;;  %13924 = vmatprep.mubr.msk.f32.mxu0 %vm15066_vm1, %v15065_v27  ;;  %v7739_v0 = vsel %vm2209_vm2, %v5920_v61, 0  ;;  %v7821_v9 = vsub.f32 %v7819_v62, %v7820_v41 }
 0x440   :  { %v14991_v1 = vpop.eup %14990  ;;  %13927 = vmatprep.subr.mxu0 %v15065_v27  ;;  %v7807_v2 = vand.u32 4294901760, %v7739_v0  ;;  %v8273_v18 = vsub.f32 %v8271_v4, %v8272_v10 }
 0x441   :  { %v5922_v3 = vmul.f32 %v14991_v1, %v15839_v46  ;;  %v7822_v44 = vand.u32 4294901760, %v7821_v9 }
 0x442   :  { %13920 = vmatmul.mubr.f32.vlgmr.msra.gmra.mrb[14].mxu1 %v15936_v36  ;;  %v7808_v5 = vsub.f32 %v7739_v0, %v7807_v2  ;;  %v8274_v21 = vand.u32 4294901760, %v8273_v18 }
 0x443   :  { %13953 = vmatpush3.msra.mxu1 %v15985_v63  ;;  %13954 = vmatprep.mubr.msk.f32.mxu1 %vm15066_vm1, %v15065_v27  ;;  %v8191_v6 = vsel %vm2209_vm2, %v5922_v3, 0 }
 0x444   :  { %v7809_v7 = vand.u32 4294901760, %v7808_v5  ;;  %13957 = vmatprep.subr.mxu1 %v15065_v27  ;;  %v8259_v8 = vand.u32 4294901760, %v8191_v6 }
 0x446   :  { %v7810_v46 = vsub.f32 %v7808_v5, %v7809_v7  ;;  %v8260_v11 = vsub.f32 %v8191_v6, %v8259_v8 }
 0x448   :  { %v7811_v15 = vand.u32 4294901760, %v7810_v46  ;;  %v8261_v17 = vand.u32 4294901760, %v8260_v11 }
 0x44a   :  { %13925 = vmatmul.mubr.f32.vlgmr.msra.gmra.mrb[18].mxu0 %v7811_v15  ;;  %v8262_v19 = vsub.f32 %v8260_v11, %v8261_v17 }
 0x44b   :  { %13928 = vmatpush3.msra.mxu0 %v7822_v44  ;;  %13929 = vmatprep.mubr.msk.f32.mxu0 %vm15066_vm1, %v15065_v27 }
 0x44c   :  { %v8263_v20 = vand.u32 4294901760, %v8262_v19  ;;  %13932 = vmatprep.subr.mxu0 %v15065_v27 }
 0x44e   :  { %13955 = vmatmul.mubr.f32.vlgmr.msra.gmra.mrb[16].mxu1 %v8263_v20 }
 0x44f   :  { %13958 = vmatpush3.msra.mxu1 %v8274_v21  ;;  %13959 = vmatprep.mubr.msk.f32.mxu1 %vm15066_vm1, %v15065_v27 }
 0x450   :  { %13962 = vmatprep.subr.mxu1 %v15065_v27 }
 0x452   :  { %13930 = vmatmul.mubr.f32.vlgmr.msra.gmra.mrb[18].mxu0 %v7807_v2 }
 0x453   :  { %13933 = vmatpush3.msra.mxu0 %v7819_v62  ;;  %13934 = vmatprep.mubr.msk.f32.mxu0 %vm15066_vm1, %v15065_v27 }
 0x454   :  { %13937 = vmatprep.subr.mxu0 %v15065_v27 }
 0x456   :  { %13960 = vmatmul.mubr.f32.vlgmr.msra.gmra.mrb[16].mxu1 %v8259_v8 }
 0x457   :  { %13963 = vmatpush3.msra.mxu1 %v8271_v4  ;;  %13964 = vmatprep.mubr.msk.f32.mxu1 %vm15066_vm1, %v15065_v27 }
 0x458   :  { %13967 = vmatprep.subr.mxu1 %v15065_v27 }
 0x45a   :  { %13935 = vmatmul.mubr.f32.vlgmr.msra.gmra.mrb[18].mxu0 %v7808_v5 }
 0x45b   :  { %13938 = vmatpush3.msra.mxu0 %v15976_v58  ;;  %13939 = vmatprep.mubr.msk.f32.mxu0 %vm15066_vm1, %v15065_v27 }
 0x45c   :  { %13942 = vmatprep.subr.mxu0 %v15065_v27 }
 0x45e   :  { %13965 = vmatmul.mubr.f32.vlgmr.msra.gmra.mrb[16].mxu1 %v8260_v11 }
 0x45f   :  { %13968 = vmatpush3.msra.mxu1 %v15985_v63  ;;  %13969 = vmatprep.mubr.msk.f32.mxu1 %vm15066_vm1, %v15065_v27 }
 0x460   :  { %13972 = vmatprep.subr.mxu1 %v15065_v27 }
 0x462   :  { %13940 = vmatmul.mubr.f32.vlgmr.msra.gmra.mrb[18].mxu0 %v7809_v7 }
 0x463   :  { %13943 = vmatpush3.msra.mxu0 %v7820_v41  ;;  %13944 = vmatprep.mubr.msk.f32.mxu0 %vm15066_vm1, %v15065_v27 }
 0x464   :  { %13947 = vmatprep.subr.mxu0 %v15065_v27 }
 0x466   :  { %13970 = vmatmul.mubr.f32.vlgmr.msra.gmra.mrb[16].mxu1 %v8261_v17 }
 0x467   :  { %13973 = vmatpush3.msra.mxu1 %v8272_v10  ;;  %13974 = vmatprep.mubr.msk.f32.mxu1 %vm15066_vm1, %v15065_v27 }
 0x468   :  { %13977 = vmatprep.subr.mxu1 %v15065_v27 }
 0x46a   :  { %13945 = vmatmul.mubr.f32.vlgmr.msra.gmra.mrb[18].mxu0 %v7807_v2 }
 0x46b   :  { %13948 = vmatpush3.msra.mxu0 %v15976_v58  ;;  %13949 = vmatprep.mubr.msk.f32.mxu0 %vm15066_vm1, %v15065_v27 }
 0x46c   :  { %13982 = vmatprep.subr.mxu0 %v15065_v27 }
 0x46e   :  { %13975 = vmatmul.mubr.f32.vlgmr.msra.gmra.mrb[16].mxu1 %v8259_v8 }
 0x46f   :  { %13978 = vmatpush3.msra.mxu1 %v15985_v63  ;;  %13979 = vmatprep.mubr.msk.f32.mxu1 %vm15066_vm1, %v15065_v27 }
 0x470   :  { %14012 = vmatprep.subr.mxu1 %v15065_v27 }
 0x472   :  { %13950 = vmatmul.mubr.f32.vlgmr.msra.gmra.mrb[18].mxu0 %v7807_v2 }
 0x473   :  { %13984 = vmatprep.mubr.msk.f32.mxu0 %vm15066_vm1, %v15065_v27 }
 0x476   :  { %13980 = vmatmul.mubr.f32.vlgmr.msra.gmra.mrb[16].mxu1 %v8259_v8  ;;  %v9544_v8 = vld [vmem:[%s16345_s3 + $0x8] sm:$0xff] }
 0x477   :  { %14014 = vmatprep.mubr.msk.f32.mxu1 %vm15066_vm1, %v15065_v27  ;;  %v10049_v9 = vand.u32 4294901760, %v9544_v8 }
 0x479   :  { %v10136_v10 = vsub.f32 %v9544_v8, %v10049_v9 }
 0x47b   :  { %v10137_v46 = vand.u32 4294901760, %v10136_v10 }
 0x47d   :  { %v10138_v11 = vsub.f32 %v10136_v10, %v10137_v46 }
 0x47f   :  { %v10139_v15 = vand.u32 4294901760, %v10138_v11 }
 0x496   :  { %v5907_v45 = vpop.xlane.xlu1 %5906 }
 0x497   :  { %14992 = vrcp.f32 %v5907_v45 }
 0x49a   :  { %v5910_v23 = vpop.xlane.xlu0 %5909  ;;  %v8640_v22 = vpop.permute.xlu1 %8639 }
 0x49b   :  { %14994 = vrcp.f32 %v5910_v23  ;;  %v16039_v13 = vand.u32 4294901760, %v8640_v22 }
 0x49d   :  { %13983 = vmatpush3.msra.mxu0 %v16039_v13  ;;  %v8723_v25 = vsub.f32 %v8640_v22, %v16039_v13 }
 0x49e   :  { %v9092_v28 = vpop.permute.xlu0 %9091  ;;  %13987 = vmatprep.subr.mxu0 %v15065_v27 }
 0x49f   :  { %v16043_v14 = vand.u32 4294901760, %v9092_v28  ;;  %v8724_v31 = vand.u32 4294901760, %v8723_v25 }
 0x4a1   :  { %v14993_v29 = vpop.eup %14992  ;;  %14013 = vmatpush3.msra.mxu1 %v16043_v14  ;;  %v9175_v38 = vsub.f32 %v9092_v28, %v16043_v14  ;;  %v8725_v12 = vsub.f32 %v8723_v25, %v8724_v31 }
 0x4a2   :  { %v5924_v30 = vmul.f32 %v14993_v29, %v15914_v24  ;;  %14017 = vmatprep.subr.mxu1 %v15065_v27 }
 0x4a3   :  { %v9176_v36 = vand.u32 4294901760, %v9175_v38  ;;  %v8726_v53 = vand.u32 4294901760, %v8725_v12 }
 0x4a4   :  { %v8643_v33 = vsel %vm2209_vm2, %v5924_v30, 0 }
 0x4a5   :  { %v14995_v34 = vpop.eup %14994  ;;  %v16050_v35 = vand.u32 4294901760, %v8643_v33  ;;  %v9177_v54 = vsub.f32 %v9175_v38, %v9176_v36 }
 0x4a6   :  { %v5926_v37 = vmul.f32 %v14995_v34, %v15925_v26  ;;  %v9545_v34 = vld [vmem:[%s16345_s3 + $0x10] sm:$0xff] }
 0x4a7   :  { %v8712_v39 = vsub.f32 %v8643_v33, %v16050_v35  ;;  %v9178_v32 = vand.u32 4294901760, %v9177_v54 }
 0x4a8   :  { %v9095_v40 = vsel %vm2209_vm2, %v5926_v37, 0 }
 0x4a9   :  { %v8713_v43 = vand.u32 4294901760, %v8712_v39  ;;  %v16056_v24 = vand.u32 4294901760, %v9095_v40 }
 0x4ab   :  { %v8714_v48 = vsub.f32 %v8712_v39, %v8713_v43  ;;  %v9164_v49 = vsub.f32 %v9095_v40, %v16056_v24 }
 0x4ad   :  { %v8715_v51 = vand.u32 4294901760, %v8714_v48  ;;  %v9165_v52 = vand.u32 4294901760, %v9164_v49 }
 0x4af   :  { %13985 = vmatmul.mubr.f32.vlgmr.msra.gmra.mrb[20].mxu0 %v8715_v51  ;;  %v9166_v26 = vsub.f32 %v9164_v49, %v9165_v52 }
 0x4b0   :  { %13988 = vmatpush3.msra.mxu0 %v8726_v53  ;;  %13989 = vmatprep.mubr.msk.f32.mxu0 %vm15066_vm1, %v15065_v27 }
 0x4b1   :  { %v9167_v47 = vand.u32 4294901760, %v9166_v26  ;;  %13992 = vmatprep.subr.mxu0 %v15065_v27 }
 0x4b3   :  { %14015 = vmatmul.mubr.f32.vlgmr.msra.gmra.mrb[18].mxu1 %v9167_v47 }
 0x4b4   :  { %14018 = vmatpush3.msra.mxu1 %v9178_v32  ;;  %14019 = vmatprep.mubr.msk.f32.mxu1 %vm15066_vm1, %v15065_v27 }
 0x4b5   :  { %14022 = vmatprep.subr.mxu1 %v15065_v27 }
 0x4b7   :  { %13990 = vmatmul.mubr.f32.vlgmr.msra.gmra.mrb[20].mxu0 %v16050_v35 }
 0x4b8   :  { %13993 = vmatpush3.msra.mxu0 %v8723_v25  ;;  %13994 = vmatprep.mubr.msk.f32.mxu0 %vm15066_vm1, %v15065_v27 }
 0x4b9   :  { %13997 = vmatprep.subr.mxu0 %v15065_v27 }
 0x4bb   :  { %14020 = vmatmul.mubr.f32.vlgmr.msra.gmra.mrb[18].mxu1 %v16056_v24 }
 0x4bc   :  { %14023 = vmatpush3.msra.mxu1 %v9175_v38  ;;  %14024 = vmatprep.mubr.msk.f32.mxu1 %vm15066_vm1, %v15065_v27 }
 0x4bd   :  { %14027 = vmatprep.subr.mxu1 %v15065_v27 }
 0x4bf   :  { %13995 = vmatmul.mubr.f32.vlgmr.msra.gmra.mrb[20].mxu0 %v8712_v39 }
 0x4c0   :  { %13998 = vmatpush3.msra.mxu0 %v16039_v13  ;;  %13999 = vmatprep.mubr.msk.f32.mxu0 %vm15066_vm1, %v15065_v27 }
 0x4c1   :  { %14002 = vmatprep.subr.mxu0 %v15065_v27 }
 0x4c3   :  { %14025 = vmatmul.mubr.f32.vlgmr.msra.gmra.mrb[18].mxu1 %v9164_v49 }
 0x4c4   :  { %14028 = vmatpush3.msra.mxu1 %v16043_v14  ;;  %14029 = vmatprep.mubr.msk.f32.mxu1 %vm15066_vm1, %v15065_v27 }
 0x4c5   :  { %14032 = vmatprep.subr.mxu1 %v15065_v27 }
 0x4c7   :  { %14000 = vmatmul.mubr.f32.vlgmr.msra.gmra.mrb[20].mxu0 %v8713_v43 }
 0x4c8   :  { %14003 = vmatpush3.msra.mxu0 %v8724_v31  ;;  %14004 = vmatprep.mubr.msk.f32.mxu0 %vm15066_vm1, %v15065_v27 }
 0x4c9   :  { %14007 = vmatprep.subr.mxu0 %v15065_v27 }
 0x4cb   :  { %14030 = vmatmul.mubr.f32.vlgmr.msra.gmra.mrb[18].mxu1 %v9165_v52 }
 0x4cc   :  { %14033 = vmatpush3.msra.mxu1 %v9176_v36  ;;  %14034 = vmatprep.mubr.msk.f32.mxu1 %vm15066_vm1, %v15065_v27 }
 0x4cd   :  { %14037 = vmatprep.subr.mxu1 %v15065_v27 }
 0x4cf   :  { %14005 = vmatmul.mubr.f32.vlgmr.msra.gmra.mrb[20].mxu0 %v16050_v35 }
 0x4d0   :  { %14008 = vmatpush3.msra.mxu0 %v16039_v13  ;;  %14009 = vmatprep.mubr.msk.f32.mxu0 %vm15066_vm1, %v15065_v27 }
 0x4d1   :  { %14042 = vmatprep.subr.mxu0 %v9554_v55 }
 0x4d3   :  { %14035 = vmatmul.mubr.f32.vlgmr.msra.gmra.mrb[18].mxu1 %v16056_v24 }
 0x4d4   :  { %14038 = vmatpush3.msra.mxu1 %v16043_v14  ;;  %14039 = vmatprep.mubr.msk.f32.mxu1 %vm15066_vm1, %v15065_v27 }
 0x4d7   :  { %v6375_v58 = vpop.f32.mrb[14].mxu0  ;;  %14010 = vmatmul.mubr.f32.vlgmr.msra.gmra.mrb[20].mxu0 %v16050_v35  ;;  %v10544_v35 = vand.u32 4294901760, %v9545_v34 }
 0x4d8   :  { %v9548_v59 = vsel %vm2209_vm2, %v6375_v58, 0  ;;  %v13831_v60 = vpop.f32.mrb[15].mxu0  ;;  %14043 = vmatpush3.msra.mxu0 %v9554_v55 }
 0x4d9   :  { %v9619_v61 = vand.u32 4294901760, %v9548_v59  ;;  %14047 = vmatprep.subr.mxu0 %v9644_v57  ;;  %v10631_v37 = vsub.f32 %v9545_v34, %v10544_v35 }
 0x4db   :  { %v9620_v62 = vsub.f32 %v9548_v59, %v9619_v61  ;;  %v6827_v63 = vpop.f32.mrb[12].mxu1  ;;  %14040 = vmatmul.mubr.f32.vlgmr.msra.gmra.mrb[18].mxu1 %v16056_v24  ;;  %v10632_v31 = vand.u32 4294901760, %v10631_v37 }
 0x4dc   :  { %v9551_v0 = vsel %vm2209_vm2, %v6827_v63, 0  ;;  %v13861_v1 = vpop.f32.mrb[13].mxu1 }
 0x4dd   :  { %v9621_v2 = vand.u32 4294901760, %v9620_v62  ;;  %v9629_v3 = vand.u32 4294901760, %v9551_v0  ;;  %v10633_v38 = vsub.f32 %v10631_v37, %v10632_v31 }
 0x4df   :  { %v9630_v27 = vsub.f32 %v9551_v0, %v9629_v3  ;;  %v9622_v41 = vsub.f32 %v9620_v62, %v9621_v2  ;;  %v10634_v12 = vand.u32 4294901760, %v10633_v38  ;;  %v11584_v38 = vld [vmem:[#allocation2 + $0x10] sm:$0xff] }
 0x4e1   :  { %v9631_v4 = vand.u32 4294901760, %v9630_v27  ;;  %v9623_v5 = vand.u32 4294901760, %v9622_v41 }
 0x4e3   :  { %v9632_v6 = vsub.f32 %v9630_v27, %v9631_v4  ;;  %14044 = vmatprep.mubr.f32.mxu0 %v9623_v5 }
 0x4e5   :  { %v9633_v7 = vand.u32 4294901760, %v9632_v6 }
 0x4e7   :  { %14045 = vmatmul.mubr.f32.vlgmr.msra.gmra.mrb[22].mxu0 %v9633_v7 }
 0x4e8   :  { %14049 = vmatprep.mubr.f32.mxu0 %v9619_v61  ;;  %14048 = vmatpush3.msra.mxu0 %v9644_v57 }
 0x4e9   :  { %14052 = vmatprep.subr.mxu0 %v9641_v56 }
 0x4ef   :  { %14050 = vmatmul.mubr.f32.vlgmr.msra.gmra.mrb[22].mxu0 %v9629_v3 }
 0x4f0   :  { %14054 = vmatprep.mubr.f32.mxu0 %v9620_v62  ;;  %14053 = vmatpush3.msra.mxu0 %v9641_v56  ;;  %v9546_v56 = vld [vmem:[%s16345_s3 + $0x18] sm:$0xff] }
 0x4f1   :  { %14057 = vmatprep.subr.mxu0 %v9554_v55 }
 0x4f7   :  { %14055 = vmatmul.mubr.f32.vlgmr.msra.gmra.mrb[22].mxu0 %v9630_v27 }
 0x4f8   :  { %14059 = vmatprep.mubr.f32.mxu0 %v9621_v2  ;;  %14058 = vmatpush3.msra.mxu0 %v9554_v55 }
 0x4f9   :  { %14062 = vmatprep.subr.mxu0 %v9642_v16 }
 0x4ff   :  { %14060 = vmatmul.mubr.f32.vlgmr.msra.gmra.mrb[22].mxu0 %v9631_v4 }
 0x500   :  { %14064 = vmatprep.mubr.f32.mxu0 %v9619_v61  ;;  %14063 = vmatpush3.msra.mxu0 %v9642_v16  ;;  %v11039_v16 = vand.u32 4294901760, %v9546_v56 }
 0x501   :  { %14067 = vmatprep.subr.mxu0 %v9554_v55 }
 0x502   :  { %v11126_v50 = vsub.f32 %v9546_v56, %v11039_v16 }
 0x504   :  { %v11127_v57 = vand.u32 4294901760, %v11126_v50 }
 0x506   :  { %v11128_v58 = vsub.f32 %v11126_v50, %v11127_v57 }
 0x507   :  { %14065 = vmatmul.mubr.f32.vlgmr.msra.gmra.mrb[22].mxu0 %v9629_v3 }
 0x508   :  { %14069 = vmatprep.mubr.f32.mxu0 %v9619_v61  ;;  %14068 = vmatpush3.msra.mxu0 %v9554_v55  ;;  %v11129_v59 = vand.u32 4294901760, %v11128_v58 }
 0x509   :  { %14072 = vmatprep.subr.mxu0 %v10049_v9 }
 0x50f   :  { %14070 = vmatmul.mubr.f32.vlgmr.msra.gmra.mrb[22].mxu0 %v9629_v3 }
 0x510   :  { %14073 = vmatpush3.msra.mxu0 %v10049_v9 }
 0x511   :  { %v7279_v17 = vpop.f32.mrb[16].mxu0  ;;  %14077 = vmatprep.subr.mxu0 %v10139_v15 }
 0x512   :  { %v10043_v44 = vsel %vm2209_vm2, %v7279_v17, 0  ;;  %v13891_v18 = vpop.f32.mrb[17].mxu0 }
 0x513   :  { %v10114_v19 = vand.u32 4294901760, %v10043_v44  ;;  %v15012_v18 = vld [vmem:[%s16342_s0 + $0x8] sm:$0xff] }
 0x515   :  { %v10115_v20 = vsub.f32 %v10043_v44, %v10114_v19  ;;  %v7731_v21 = vpop.f32.mrb[14].mxu1 }
 0x516   :  { %v10046_v45 = vsel %vm2209_vm2, %v7731_v21, 0  ;;  %v13921_v23 = vpop.f32.mrb[15].mxu1 }
 0x517   :  { %v10116_v22 = vand.u32 4294901760, %v10115_v20  ;;  %v10124_v13 = vand.u32 4294901760, %v10046_v45 }
 0x519   :  { %v10125_v28 = vsub.f32 %v10046_v45, %v10124_v13  ;;  %v10117_v14 = vsub.f32 %v10115_v20, %v10116_v22 }
 0x51b   :  { %v10126_v29 = vand.u32 4294901760, %v10125_v28  ;;  %v10118_v30 = vand.u32 4294901760, %v10117_v14 }
 0x51d   :  { %v10127_v25 = vsub.f32 %v10125_v28, %v10126_v29  ;;  %14074 = vmatprep.mubr.f32.mxu0 %v10118_v30 }
 0x51f   :  { %v10128_v33 = vand.u32 4294901760, %v10127_v25 }
 0x521   :  { %14075 = vmatmul.mubr.f32.vlgmr.msra.gmra.mrb[22].mxu0 %v10128_v33 }
 0x522   :  { %14079 = vmatprep.mubr.f32.mxu0 %v10114_v19  ;;  %14078 = vmatpush3.msra.mxu0 %v10139_v15 }
 0x523   :  { %14082 = vmatprep.subr.mxu0 %v10136_v10 }
 0x529   :  { %14080 = vmatmul.mubr.f32.vlgmr.msra.gmra.mrb[22].mxu0 %v10124_v13 }
 0x52a   :  { %14084 = vmatprep.mubr.f32.mxu0 %v10115_v20  ;;  %14083 = vmatpush3.msra.mxu0 %v10136_v10  ;;  %v44_v10 = vld [vmem:[%s16348_s6 + $0x8] sm:$0xff]  ;;  %v15013_v20 = vld [vmem:[%s16342_s0] sm:$0xff] }
 0x52b   :  { %14087 = vmatprep.subr.mxu0 %v10049_v9 }
 0x531   :  { %14085 = vmatmul.mubr.f32.vlgmr.msra.gmra.mrb[22].mxu0 %v10125_v28 }
 0x532   :  { %14089 = vmatprep.mubr.f32.mxu0 %v10116_v22  ;;  %14088 = vmatpush3.msra.mxu0 %v10049_v9 }
 0x533   :  { %14092 = vmatprep.subr.mxu0 %v10137_v46 }
 0x539   :  { %14090 = vmatmul.mubr.f32.vlgmr.msra.gmra.mrb[22].mxu0 %v10126_v29 }
 0x53a   :  { %14094 = vmatprep.mubr.f32.mxu0 %v10114_v19  ;;  %14093 = vmatpush3.msra.mxu0 %v10137_v46  ;;  %v43_v46 = vld [vmem:[%s16348_s6] sm:$0xff] }
 0x53b   :  { %14097 = vmatprep.subr.mxu0 %v10049_v9 }
 0x541   :  { %14095 = vmatmul.mubr.f32.vlgmr.msra.gmra.mrb[22].mxu0 %v10124_v13 }
 0x542   :  { %14099 = vmatprep.mubr.f32.mxu0 %v10114_v19  ;;  %14098 = vmatpush3.msra.mxu0 %v10049_v9 }
 0x543   :  { %14102 = vmatprep.subr.mxu0 %v10544_v35 }
 0x545   :  { %v8183_v39 = vpop.f32.mrb[18].mxu0 }
 0x546   :  { %v10538_v40 = vsel %vm2209_vm2, %v8183_v39, 0  ;;  %v13951_v43 = vpop.f32.mrb[19].mxu0 }
 0x547   :  { %v10609_v24 = vand.u32 4294901760, %v10538_v40  ;;  %v11585_v43 = vld [vmem:[#allocation2 + $0x18] sm:$0xff] }
 0x549   :  { %v10610_v36 = vsub.f32 %v10538_v40, %v10609_v24  ;;  %14100 = vmatmul.mubr.f32.vlgmr.msra.gmra.mrb[22].mxu0 %v10124_v13  ;;  %v8635_v48 = vpop.f32.mrb[16].mxu1 }
 0x54a   :  { %v10541_v49 = vsel %vm2209_vm2, %v8635_v48, 0  ;;  %v13981_v51 = vpop.f32.mrb[17].mxu1  ;;  %14103 = vmatpush3.msra.mxu0 %v10544_v35 }
 0x54b   :  { %v10611_v52 = vand.u32 4294901760, %v10610_v36  ;;  %v10619_v53 = vand.u32 4294901760, %v10541_v49  ;;  %14107 = vmatprep.subr.mxu0 %v10634_v12 }
 0x54d   :  { %v10620_v54 = vsub.f32 %v10541_v49, %v10619_v53  ;;  %v10612_v26 = vsub.f32 %v10610_v36, %v10611_v52 }
 0x54f   :  { %v10621_v47 = vand.u32 4294901760, %v10620_v54  ;;  %v10613_v32 = vand.u32 4294901760, %v10612_v26 }
 0x551   :  { %v10622_v42 = vsub.f32 %v10620_v54, %v10621_v47  ;;  %14104 = vmatprep.mubr.f32.mxu0 %v10613_v32 }
 0x553   :  { %v10623_v55 = vand.u32 4294901760, %v10622_v42 }
 0x555   :  { %14105 = vmatmul.mubr.f32.vlgmr.msra.gmra.mrb[22].mxu0 %v10623_v55 }
 0x556   :  { %14109 = vmatprep.mubr.f32.mxu0 %v10609_v24  ;;  %14108 = vmatpush3.msra.mxu0 %v10634_v12  ;;  %v11602_v12 = vand.u32 4294901760, %v11585_v43 }
 0x557   :  { %14112 = vmatprep.subr.mxu0 %v10631_v37 }
 0x558   :  { %v11704_v32 = vsub.f32 %v11585_v43, %v11602_v12 }
 0x55d   :  { %14110 = vmatmul.mubr.f32.vlgmr.msra.gmra.mrb[22].mxu0 %v10619_v53 }
 0x55e   :  { %14114 = vmatprep.mubr.f32.mxu0 %v10610_v36  ;;  %14113 = vmatpush3.msra.mxu0 %v10631_v37  ;;  %v11582_v37 = vld [vmem:[#allocation2] sm:$0xff] }
 0x55f   :  { %14117 = vmatprep.subr.mxu0 %v10544_v35  ;;  %v11593_v39 = vand.u32 4294901760, %v11582_v37 }
 0x561   :  { %v11683_v49 = vsub.f32 %v11582_v37, %v11593_v39 }
 0x565   :  { %14115 = vmatmul.mubr.f32.vlgmr.msra.gmra.mrb[22].mxu0 %v10620_v54 }
 0x566   :  { %14119 = vmatprep.mubr.f32.mxu0 %v10611_v52  ;;  %14118 = vmatpush3.msra.mxu0 %v10544_v35  ;;  %v11684_v52 = vand.u32 4294901760, %v11683_v49 }
 0x567   :  { %14122 = vmatprep.subr.mxu0 %v10632_v31 }
 0x568   :  { %v11685_v54 = vsub.f32 %v11683_v49, %v11684_v52 }
 0x56a   :  { %v11686_v42 = vand.u32 4294901760, %v11685_v54 }
 0x56d   :  { %14120 = vmatmul.mubr.f32.vlgmr.msra.gmra.mrb[22].mxu0 %v10621_v47 }
 0x56e   :  { %14124 = vmatprep.mubr.f32.mxu0 %v10609_v24  ;;  %14123 = vmatpush3.msra.mxu0 %v10632_v31  ;;  %v11583_v31 = vld [vmem:[#allocation2 + $0x8] sm:$0xff] }
 0x56f   :  { %14127 = vmatprep.subr.mxu0 %v10544_v35  ;;  %v11596_v40 = vand.u32 4294901760, %v11583_v31 }
 0x571   :  { %v16141_v36 = vpack.c.bf16 %v11596_v40, %v11593_v39  ;;  %v11690_v51 = vsub.f32 %v11583_v31, %v11596_v40  ;;  %v12787_v31 = vld [vmem:[%s16348_s6 + $0x38] sm:$0xff]  ;;  %v12786_v39 = vld [vmem:[%s16348_s6 + $0x30] sm:$0xff] }
 0x573   :  { %14535 = vmatprep.subr.bf16.mxu1 %v16141_v36 }
 0x574   :  { %14537 = vmatpush3.bf16.msra.mxu1 %v16141_v36 }
 0x575   :  { %14125 = vmatmul.mubr.f32.vlgmr.msra.gmra.mrb[22].mxu0 %v10619_v53 }
 0x576   :  { %14129 = vmatprep.mubr.f32.mxu0 %v10609_v24  ;;  %14128 = vmatpush3.msra.mxu0 %v10544_v35  ;;  %v11599_v24 = vand.u32 4294901760, %v11584_v38 }
 0x577   :  { %14132 = vmatprep.subr.mxu0 %v11039_v16 }
 0x578   :  { %v16143_v48 = vpack.c.bf16 %v11602_v12, %v11599_v24  ;;  %v11697_v47 = vsub.f32 %v11584_v38, %v11599_v24  ;;  %v12789_v24 = vld [vmem:[%s16348_s6 + $0x48] sm:$0xff]  ;;  %v12788_v12 = vld [vmem:[%s16348_s6 + $0x40] sm:$0xff] }
 0x57a   :  { %14539 = vmatprep.subr.bf16.mxu1 %v16143_v48  ;;  %v11698_v56 = vand.u32 4294901760, %v11697_v47 }
 0x57b   :  { %14541 = vmatpush3.bf16.msra.mxu1 %v16143_v48 }
 0x57d   :  { %14130 = vmatmul.mubr.f32.vlgmr.msra.gmra.mrb[22].mxu0 %v10619_v53  ;;  %v11691_v53 = vand.u32 4294901760, %v11690_v51 }
 0x57e   :  { %14133 = vmatpush3.msra.mxu0 %v11039_v16 }
 0x57f   :  { %14137 = vmatprep.subr.mxu0 %v11129_v59  ;;  %v11692_v26 = vsub.f32 %v11690_v51, %v11691_v53 }
 0x581   :  { %v11693_v55 = vand.u32 4294901760, %v11692_v26 }
 0x5aa   :  { %v9087_v60 = vpop.f32.mrb[20].mxu0 }
 0x5ab   :  { %v11033_v61 = vsel %vm2209_vm2, %v9087_v60, 0  ;;  %v14011_v62 = vpop.f32.mrb[21].mxu0 }
 0x5ac   :  { %v11104_v63 = vand.u32 4294901760, %v11033_v61  ;;  %v16154_v62 = vpack.c.bf16 %v11690_v51, %v11683_v49 }
 0x5ae   :  { %v11105_v0 = vsub.f32 %v11033_v61, %v11104_v63  ;;  %v9539_v1 = vpop.f32.mrb[18].mxu1 }
 0x5af   :  { %v11036_v2 = vsel %vm2209_vm2, %v9539_v1, 0  ;;  %v14041_v3 = vpop.f32.mrb[19].mxu1 }
 0x5b0   :  { %v11106_v27 = vand.u32 4294901760, %v11105_v0  ;;  %v11114_v41 = vand.u32 4294901760, %v11036_v2  ;;  %v12123_v3 = vld [vmem:[%s16347_s5 + $0x8] sm:$0xff] }
 0x5b2   :  { %v11115_v4 = vsub.f32 %v11036_v2, %v11114_v41  ;;  %v11107_v5 = vsub.f32 %v11105_v0, %v11106_v27  ;;  %v12122_v2 = vld [vmem:[%s16347_s5] sm:$0xff] }
 0x5b4   :  { %v11116_v6 = vand.u32 4294901760, %v11115_v4  ;;  %v11108_v7 = vand.u32 4294901760, %v11107_v5  ;;  %v12125_v5 = vld [vmem:[%s16347_s5 + $0x18] sm:$0xff] }
 0x5b6   :  { %v11117_v8 = vsub.f32 %v11115_v4, %v11116_v6  ;;  %14134 = vmatprep.mubr.f32.mxu0 %v11108_v7  ;;  %v12147_v7 = vand.u32 4294901760, %v12125_v5 }
 0x5b8   :  { %v11118_v9 = vand.u32 4294901760, %v11117_v8 }
 0x5ba   :  { %14135 = vmatmul.mubr.f32.vlgmr.msra.gmra.mrb[22].mxu0 %v11118_v9 }
 0x5bb   :  { %14139 = vmatprep.mubr.f32.mxu0 %v11104_v63  ;;  %14138 = vmatpush3.msra.mxu0 %v11129_v59 }
 0x5bc   :  { %14142 = vmatprep.subr.mxu0 %v11126_v50 }
 0x5c2   :  { %14140 = vmatmul.mubr.f32.vlgmr.msra.gmra.mrb[22].mxu0 %v11114_v41 }
 0x5c3   :  { %14144 = vmatprep.mubr.f32.mxu0 %v11105_v0  ;;  %14143 = vmatpush3.msra.mxu0 %v11126_v50  ;;  %v16149_v50 = vpack.c.bf16 %v11693_v55, %v11686_v42  ;;  %v16158_v0 = vpack.c.bf16 %v11691_v53, %v11684_v52 }
 0x5c4   :  { %14147 = vmatprep.subr.mxu0 %v11039_v16 }
 0x5c5   :  { %14543 = vmatprep.subr.bf16.mxu1 %v16149_v50 }
 0x5ca   :  { %14145 = vmatmul.mubr.f32.vlgmr.msra.gmra.mrb[22].mxu0 %v11115_v4  ;;  %v12124_v4 = vld [vmem:[%s16347_s5 + $0x10] sm:$0xff] }
 0x5cb   :  { %14149 = vmatprep.mubr.f32.mxu0 %v11106_v27  ;;  %14148 = vmatpush3.msra.mxu0 %v11039_v16  ;;  %v12138_v27 = vand.u32 4294901760, %v12122_v2 }
 0x5cc   :  { %14152 = vmatprep.subr.mxu0 %v11127_v57 }
 0x5cd   :  { %v16176_v9 = vsub.f32 %v12122_v2, %v12138_v27 }
 0x5d2   :  { %14150 = vmatmul.mubr.f32.vlgmr.msra.gmra.mrb[22].mxu0 %v11116_v6  ;;  %v12144_v6 = vand.u32 4294901760, %v12124_v4 }
 0x5d3   :  { %14154 = vmatprep.mubr.f32.mxu0 %v11104_v63  ;;  %14153 = vmatpush3.msra.mxu0 %v11127_v57  ;;  %v11699_v57 = vsub.f32 %v11697_v47, %v11698_v56 }
 0x5d4   :  { %14157 = vmatprep.subr.mxu0 %v11039_v16 }
 0x5d5   :  { %v11700_v59 = vand.u32 4294901760, %v11699_v57 }
 0x5da   :  { %14155 = vmatmul.mubr.f32.vlgmr.msra.gmra.mrb[22].mxu0 %v11114_v41 }
 0x5db   :  { %14159 = vmatprep.mubr.f32.mxu0 %v11104_v63  ;;  %14158 = vmatpush3.msra.mxu0 %v11039_v16  ;;  %v11705_v16 = vand.u32 4294901760, %v11704_v32  ;;  %v16156_v63 = vpack.c.bf16 %v11704_v32, %v11697_v47 }
 0x5dd   :  { %v11706_v58 = vsub.f32 %v11704_v32, %v11705_v16  ;;  %v16160_v1 = vpack.c.bf16 %v11705_v16, %v11698_v56 }
 0x5df   :  { %v11707_v60 = vand.u32 4294901760, %v11706_v58 }
 0x5e1   :  { %v16152_v61 = vpack.c.bf16 %v11707_v60, %v11700_v59 }
 0x5e2   :  { %14160 = vmatmul.mubr.f32.vlgmr.msra.gmra.mrb[22].mxu0 %v11114_v41  ;;  %v12141_v41 = vand.u32 4294901760, %v12123_v3 }
 0x5e4   :  { %v16174_v8 = vpack.c.bf16 %v12141_v41, %v12138_v27 }
 0x5e6   :  { %14583 = vmatprep.subr.bf16.mxu0 %v16174_v8 }
 0x5e7   :  { %14585 = vmatpush3.bf16.msra.mxu0 %v16174_v8 }
 0x6b5   :  { %v14161_v11 = vpop.f32.mrb[22].mxu0 }
 0x6b6   :  { %v11534_v15 = vadd.f32 %v14161_v11, %v44_v10  ;;  %v11517_v17 = vpop.f32.mrb[23].mxu0  ;;  %v16178_v10 = vsub.f32 %v12123_v3, %v12141_v41  ;;  %v16182_v11 = vsub.f32 %v12124_v4, %v12144_v6 }
 0x6b7   :  { %v11533_v44 = vadd.f32 %v11517_v17, %v43_v46  ;;  %v16180_v46 = vpack.c.bf16 %v12147_v7, %v12144_v6  ;;  %v12126_v6 = vld [vmem:[%s16347_s5 + $0x20] sm:$0xff] }
 0x6b8   :  { %v11536_v19 = vadd.f32 %v15012_v18, %v11534_v15  ;;  %v16184_v15 = vsub.f32 %v12125_v5, %v12147_v7  ;;  %v12240_v59 = vand.u32 4294901760, %v16178_v10  ;;  %v12150_v7 = vand.u32 4294901760, %v12126_v6 }
 0x6b9   :  { %v11535_v21 = vadd.f32 %v15013_v20, %v11533_v44  ;;  %14587 = vmatprep.subr.bf16.mxu0 %v16180_v46 }
 0x6ba   :  { %v11540_v45 = vsel %vm87_vm0, %v11536_v19, 0.0  ;;  %14589 = vmatpush3.bf16.msra.mxu0 %v16180_v46 }
 0x6bb   :  { %11541 = vadd.xlane.f32.xlu0 %v11540_v45  ;;  %v11537_v23 = vsel %vm87_vm0, %v11535_v21, 0.0 }
 0x6bc   :  { %11538 = vadd.xlane.f32.xlu1 %v11537_v23 }
 0x748   :  { %v11542_v22 = vpop.xlane.xlu0 %11541 }
 0x749   :  { %v11545_v13 = vmul.f32 0.03125, %v11542_v22  ;;  %v11539_v28 = vpop.xlane.xlu1 %11538 }
 0x74a   :  { %v11544_v14 = vmul.f32 0.03125, %v11539_v28 }
 0x74b   :  { %v16131_v29 = vsub.f32 %v11536_v19, %v11545_v13 }
 0x74c   :  { %v16133_v30 = vsub.f32 %v11535_v21, %v11544_v14 }
 0x74d   :  { %v11549_v25 = vmul.f32 %v16131_v29, %v16131_v29 }
 0x74e   :  { %v11548_v33 = vmul.f32 %v16133_v30, %v16133_v30 }
 0x74f   :  { %v11553_v34 = vsel %vm87_vm0, %v11549_v25, 0.0 }
 0x750   :  { %11554 = vadd.xlane.f32.xlu0 %v11553_v34  ;;  %v11550_v35 = vsel %vm87_vm0, %v11548_v33, 0.0 }
 0x751   :  { %11551 = vadd.xlane.f32.xlu1 %v11550_v35 }
 0x7dd   :  { %v11555_v17 = vpop.xlane.xlu0 %11554 }
 0x7de   :  { %v11557_v44 = vmul.f32 0.03125, %v11555_v17  ;;  %v11552_v18 = vpop.xlane.xlu1 %11551 }
 0x7df   :  { %v11556_v19 = vmul.f32 0.03125, %v11552_v18 }
 0x7e0   :  { %v11559_v20 = vadd.f32 1e-05, %v11557_v44  ;;  %v12260_v44 = vsub.f32 %v12126_v6, %v12150_v7 }
 0x7e1   :  { %v11558_v21 = vadd.f32 1e-05, %v11556_v19  ;;  %v12129_v19 = vld [vmem:[%s16347_s5 + $0x38] sm:$0xff] }
 0x7e2   :  { %14996 = vrsqrt.f32 %v11559_v20  ;;  %vm11569_vm3 = vcmp.eq.f32.partialorder %v11559_v20, inf  ;;  %v11572_v13 = vand.u32 2147483648, %v11559_v20  ;;  %vm11571_vm4 = vcmp.eq.f32.partialorder %v11559_v20, 0.0 }
 0x7e3   :  { %14998 = vrsqrt.f32 %v11558_v21  ;;  %vm11562_vm5 = vcmp.eq.f32.partialorder %v11558_v21, inf  ;;  %v11565_v25 = vand.u32 2147483648, %v11558_v21  ;;  %vm11564_vm6 = vcmp.eq.f32.partialorder %v11558_v21, 0.0 }
 0x7ec   :  { %v14997_v45 = vpop.eup %14996 }
 0x7ed   :  { %v14999_v23 = vpop.eup %14998  ;;  %v11568_v22 = vmul.f32 %v14997_v45, %v11559_v20 }
 0x7ee   :  { %v11561_v28 = vmul.f32 %v14999_v23, %v11558_v21  ;;  %v12159_v23 = vand.u32 4294901760, %v12129_v19 }
 0x7ef   :  { %v11570_v14 = vsel %vm11569_vm3, %v11559_v20, %v11568_v22  ;;  %v12261_v20 = vand.u32 4294901760, %v12260_v44 }
 0x7f0   :  { %v11573_v33 = vsel %vm11571_vm4, %v11572_v13, %v11570_v14  ;;  %v11563_v34 = vsel %vm11562_vm5, %v11558_v21, %v11561_v28  ;;  %v12281_v14 = vsub.f32 %v12129_v19, %v12159_v23 }
 0x7f1   :  { %15000 = vrcp.f32 %v11573_v33  ;;  %v11566_v35 = vsel %vm11564_vm6, %v11565_v25, %v11563_v34  ;;  %v12262_v22 = vsub.f32 %v12260_v44, %v12261_v20 }
 0x7f2   :  { %15002 = vrcp.f32 %v11566_v35  ;;  %v12282_v35 = vand.u32 4294901760, %v12281_v14 }
 0x7f3   :  { %v12263_v25 = vand.u32 4294901760, %v12262_v22 }
 0x7fb   :  { %v15001_v37 = vpop.eup %15000 }
 0x7fc   :  { %v15003_v38 = vpop.eup %15002  ;;  %v11577_v40 = vmul.f32 %v15001_v37, %v16131_v29 }
 0x7fd   :  { %v11575_v43 = vmul.f32 %v15003_v38, %v16133_v30  ;;  %v12283_v38 = vsub.f32 %v12281_v14, %v12282_v35 }
 0x7fe   :  { %v11579_v49 = vmul.f32 %v12787_v31, %v11577_v40 }
 0x7ff   :  { %v11578_v51 = vmul.f32 %v12786_v39, %v11575_v43  ;;  %v12284_v40 = vand.u32 4294901760, %v12283_v38 }
 0x800   :  { %v16204_v52 = vadd.f32 %v12789_v24, %v11579_v49  ;;  %v14614_v24 = vpack.c.bf16 %v16178_v10, %v16176_v9 }
 0x801   :  { %v16206_v53 = vadd.f32 %v12788_v12, %v11578_v51 }
 0x802   :  { %v11590_v54 = vsel %vm87_vm0, %v16204_v52, 0 }
 0x803   :  { %v11587_v29 = vsel %vm87_vm0, %v16206_v53, 0  ;;  %v11671_v30 = vand.u32 4294901760, %v11590_v54 }
 0x804   :  { %v11661_v26 = vand.u32 4294901760, %v11587_v29 }
 0x805   :  { %v11672_v47 = vsub.f32 %v11590_v54, %v11671_v30 }
 0x806   :  { %v11662_v32 = vsub.f32 %v11587_v29, %v11661_v26 }
 0x807   :  { %v11673_v42 = vand.u32 4294901760, %v11672_v47 }
 0x808   :  { %v11663_v55 = vand.u32 4294901760, %v11662_v32 }
 0x809   :  { %v11674_v56 = vsub.f32 %v11672_v47, %v11673_v42 }
 0x80a   :  { %v11664_v16 = vsub.f32 %v11662_v32, %v11663_v55 }
 0x80b   :  { %v11675_v58 = vand.u32 4294901760, %v11674_v56 }
 0x80c   :  { %v11665_v57 = vand.u32 4294901760, %v11664_v16 }
 0x80e   :  { %14170 = vmatprep.mubr.f32.mxu1 %v11665_v57 }
 0x80f   :  { %14171 = vmatmul.mubr.f32.vlgmr.msra.gmra.mrb[20].mxu1 %v11675_v58 }
 0x810   :  { %14545 = vmatpush3.bf16.msra.mxu1 %v16149_v50  ;;  %14181 = vmatprep.mubr.f32.mxu1 %v11661_v26  ;;  %v12233_v50 = vand.u32 4294901760, %v16176_v9 }
 0x811   :  { %14547 = vmatprep.subr.bf16.mxu1 %v16152_v61 }
 0x812   :  { %v12234_v60 = vsub.f32 %v16176_v9, %v12233_v50 }
 0x814   :  { %14549 = vmatpush3.bf16.msra.mxu1 %v16152_v61  ;;  %v12241_v61 = vsub.f32 %v16178_v10, %v12240_v59 }
 0x815   :  { %14551 = vmatprep.subr.bf16.mxu1 %v16154_v62 }
 0x816   :  { %v12242_v2 = vand.u32 4294901760, %v12241_v61 }
 0x817   :  { %14182 = vmatmul.mubr.f32.vlgmr.msra.gmra.mrb[20].mxu1 %v11671_v30 }
 0x818   :  { %14553 = vmatpush3.bf16.msra.mxu1 %v16154_v62  ;;  %14192 = vmatprep.mubr.f32.mxu1 %v11662_v32  ;;  %v12247_v62 = vand.u32 4294901760, %v16182_v11 }
 0x819   :  { %14555 = vmatprep.subr.bf16.mxu1 %v16156_v63 }
 0x81a   :  { %v12248_v3 = vsub.f32 %v16182_v11, %v12247_v62 }
 0x81c   :  { %14557 = vmatpush3.bf16.msra.mxu1 %v16156_v63  ;;  %v12254_v63 = vand.u32 4294901760, %v16184_v15 }
 0x81d   :  { %14559 = vmatprep.subr.bf16.mxu1 %v16141_v36 }
 0x81e   :  { %v12255_v27 = vsub.f32 %v16184_v15, %v12254_v63 }
 0x81f   :  { %14193 = vmatmul.mubr.f32.vlgmr.msra.gmra.mrb[20].mxu1 %v11672_v47  ;;  %v12782_v47 = vld [vmem:[%s16348_s6 + $0x10] sm:$0xff] }
 0x820   :  { %14561 = vmatpush3.bf16.msra.mxu1 %v16141_v36  ;;  %14203 = vmatprep.mubr.f32.mxu1 %v11663_v55  ;;  %v12256_v4 = vand.u32 4294901760, %v12255_v27 }
 0x821   :  { %14563 = vmatprep.subr.bf16.mxu1 %v16143_v48 }
 0x824   :  { %14565 = vmatpush3.bf16.msra.mxu1 %v16143_v48 }
 0x825   :  { %14567 = vmatprep.subr.bf16.mxu1 %v16158_v0 }
 0x827   :  { %14204 = vmatmul.mubr.f32.vlgmr.msra.gmra.mrb[20].mxu1 %v11673_v42 }
 0x828   :  { %14569 = vmatpush3.bf16.msra.mxu1 %v16158_v0  ;;  %14214 = vmatprep.mubr.f32.mxu1 %v11661_v26  ;;  %v12235_v0 = vand.u32 4294901760, %v12234_v60 }
 0x829   :  { %14571 = vmatprep.subr.bf16.mxu1 %v16160_v1 }
 0x82a   :  { %v14598_v41 = vpack.c.bf16 %v12242_v2, %v12235_v0 }
 0x82c   :  { %14573 = vmatpush3.bf16.msra.mxu1 %v16160_v1  ;;  %v12249_v1 = vand.u32 4294901760, %v12248_v3  ;;  %v14618_v3 = vpack.c.bf16 %v16184_v15, %v16182_v11  ;;  %v12784_v11 = vld [vmem:[%s16348_s6 + $0x20] sm:$0xff] }
 0x82d   :  { %14575 = vmatprep.subr.bf16.mxu1 %v16141_v36 }
 0x82e   :  { %v14602_v5 = vpack.c.bf16 %v12256_v4, %v12249_v1 }
 0x82f   :  { %14215 = vmatmul.mubr.f32.vlgmr.msra.gmra.mrb[20].mxu1 %v11671_v30 }
 0x830   :  { %14577 = vmatpush3.bf16.msra.mxu1 %v16141_v36  ;;  %14225 = vmatprep.mubr.f32.mxu1 %v11661_v26  ;;  %v12127_v36 = vld [vmem:[%s16347_s5 + $0x28] sm:$0xff]  ;;  %v12783_v26 = vld [vmem:[%s16348_s6 + $0x18] sm:$0xff] }
 0x831   :  { %14579 = vmatprep.subr.bf16.mxu1 %v16143_v48  ;;  %v12153_v17 = vand.u32 4294901760, %v12127_v36 }
 0x833   :  { %v12267_v18 = vsub.f32 %v12127_v36, %v12153_v17  ;;  %v16261_v12 = vpack.c.bf16 %v12153_v17, %v12150_v7  ;;  %v14646_v7 = vpack.c.bf16 %v12240_v59, %v12233_v50  ;;  %v14650_v17 = vpack.c.bf16 %v12254_v63, %v12247_v62 }
 0x834   :  { %14581 = vmatpush3.bf16.msra.mxu1 %v16143_v48  ;;  %v12128_v48 = vld [vmem:[%s16347_s5 + $0x30] sm:$0xff] }
 0x835   :  { %14599 = vmatprep.subr.bf16.mxu1 %v14598_v41  ;;  %v12268_v21 = vand.u32 4294901760, %v12267_v18  ;;  %v12156_v45 = vand.u32 4294901760, %v12128_v48  ;;  %14591 = vmatprep.subr.bf16.mxu0 %v16261_v12  ;;  %v14622_v51 = vpack.c.bf16 %v12267_v18, %v12260_v44 }
 0x836   :  { %14593 = vmatpush3.bf16.msra.mxu0 %v16261_v12 }
 0x837   :  { %14226 = vmatmul.mubr.f32.vlgmr.msra.gmra.mrb[20].mxu1 %v11671_v30  ;;  %v12269_v13 = vsub.f32 %v12267_v18, %v12268_v21  ;;  %v12274_v28 = vsub.f32 %v12128_v48, %v12156_v45  ;;  %v16263_v49 = vpack.c.bf16 %v12159_v23, %v12156_v45  ;;  %v14654_v29 = vpack.c.bf16 %v12268_v21, %v12261_v20 }
 0x838   :  { %14601 = vmatpush3.bf16.msra.mxu1 %v14598_v41 }
 0x839   :  { %14603 = vmatprep.subr.bf16.mxu1 %v14602_v5  ;;  %v12270_v33 = vand.u32 4294901760, %v12269_v13  ;;  %v12275_v34 = vand.u32 4294901760, %v12274_v28  ;;  %14595 = vmatprep.subr.bf16.mxu0 %v16263_v49  ;;  %v14626_v54 = vpack.c.bf16 %v12281_v14, %v12274_v28 }
 0x83a   :  { %14597 = vmatpush3.bf16.msra.mxu0 %v16263_v49 }
 0x83b   :  { %v14606_v37 = vpack.c.bf16 %v12270_v33, %v12263_v25  ;;  %v12276_v31 = vsub.f32 %v12274_v28, %v12275_v34  ;;  %v14658_v30 = vpack.c.bf16 %v12282_v35, %v12275_v34 }
 0x83c   :  { %14605 = vmatpush3.bf16.msra.mxu1 %v14602_v5 }
 0x83d   :  { %14607 = vmatprep.subr.bf16.mxu1 %v14606_v37  ;;  %v12277_v39 = vand.u32 4294901760, %v12276_v31 }
 0x83f   :  { %v14610_v43 = vpack.c.bf16 %v12284_v40, %v12277_v39 }
 0x840   :  { %14609 = vmatpush3.bf16.msra.mxu1 %v14606_v37 }
 0x841   :  { %14611 = vmatprep.subr.bf16.mxu1 %v14610_v43 }
 0x844   :  { %14613 = vmatpush3.bf16.msra.mxu1 %v14610_v43 }
 0x845   :  { %14615 = vmatprep.subr.bf16.mxu1 %v14614_v24 }
 0x90a   :  { %v14227_v32 = vpop.f32.mrb[20].mxu1 }
 0x90b   :  { %v14688_v42 = vadd.f32 %v14227_v32, %v12783_v26  ;;  %v12110_v55 = vpop.f32.mrb[21].mxu1  ;;  %v12791_v26 = vld [vmem:[%s16348_s6 + $0x58] sm:$0xff]  ;;  %v12790_v32 = vld [vmem:[%s16348_s6 + $0x50] sm:$0xff] }
 0x90c   :  { %v14689_v56 = vadd.f32 %v12782_v47, %v12110_v55  ;;  %v12793_v55 = vld [vmem:[%s16348_s6 + $0x68] sm:$0xff] }
 0x90d   :  { %v12121_v16 = vmax.f32 %v14688_v42, 0.0 }
 0x90e   :  { %v12120_v57 = vmax.f32 %v14689_v56, 0.0 }
 0x90f   :  { %v12135_v58 = vsel %vm12130_vm7, %v12121_v16, 0  ;;  %v12792_v16 = vld [vmem:[%s16348_s6 + $0x60] sm:$0xff] }
 0x910   :  { %v12220_v60 = vand.u32 4294901760, %v12135_v58  ;;  %v12132_v61 = vsel %vm12130_vm7, %v12120_v57, 0 }
 0x911   :  { %v12210_v0 = vand.u32 4294901760, %v12132_v61 }
 0x912   :  { %v12221_v2 = vsub.f32 %v12135_v58, %v12220_v60 }
 0x913   :  { %14263 = vmatprep.mubr.f32.mxu1 %v12210_v0  ;;  %v12211_v27 = vsub.f32 %v12132_v61, %v12210_v0 }
 0x914   :  { %v12222_v41 = vand.u32 4294901760, %v12221_v2  ;;  %14264 = vmatmul.mubr.f32.vlgmr.msra.gmra.mrb[22].mxu1 %v12220_v60 }
 0x915   :  { %14617 = vmatpush3.bf16.msra.mxu1 %v14614_v24  ;;  %14282 = vmatprep.mubr.f32.mxu1 %v12211_v27  ;;  %v12212_v1 = vand.u32 4294901760, %v12211_v27 }
 0x916   :  { %14619 = vmatprep.subr.bf16.mxu1 %v14618_v3  ;;  %v12223_v4 = vsub.f32 %v12221_v2, %v12222_v41 }
 0x917   :  { %v12213_v5 = vsub.f32 %v12211_v27, %v12212_v1 }
 0x918   :  { %v12224_v36 = vand.u32 4294901760, %v12223_v4 }
 0x919   :  { %14621 = vmatpush3.bf16.msra.mxu1 %v14618_v3  ;;  %v12214_v6 = vand.u32 4294901760, %v12213_v5 }
 0x91a   :  { %14623 = vmatprep.subr.bf16.mxu1 %v14622_v51 }
 0x91b   :  { %14244 = vmatprep.mubr.f32.mxu0 %v12214_v6 }
 0x91c   :  { %14245 = vmatmul.mubr.f32.vlgmr.msra.gmra.mrb[24].mxu0 %v12224_v36 }
 0x91d   :  { %14625 = vmatpush3.bf16.msra.mxu1 %v14622_v51 }
 0x91e   :  { %14627 = vmatprep.subr.bf16.mxu1 %v14626_v54 }
 0x921   :  { %14629 = vmatpush3.bf16.msra.mxu1 %v14626_v54 }
 0x922   :  { %14631 = vmatprep.subr.bf16.mxu1 %v16174_v8 }
 0x924   :  { %14283 = vmatmul.mubr.f32.vlgmr.msra.gmra.mrb[22].mxu1 %v12221_v2 }
 0x925   :  { %14633 = vmatpush3.bf16.msra.mxu1 %v16174_v8  ;;  %14301 = vmatprep.mubr.f32.mxu1 %v12212_v1 }
 0x926   :  { %14635 = vmatprep.subr.bf16.mxu1 %v16180_v46 }
 0x929   :  { %14637 = vmatpush3.bf16.msra.mxu1 %v16180_v46 }
 0x92a   :  { %14639 = vmatprep.subr.bf16.mxu1 %v16261_v12 }
 0x92d   :  { %14641 = vmatpush3.bf16.msra.mxu1 %v16261_v12 }
 0x92e   :  { %14643 = vmatprep.subr.bf16.mxu1 %v16263_v49 }
 0x931   :  { %14645 = vmatpush3.bf16.msra.mxu1 %v16263_v49 }
 0x932   :  { %14647 = vmatprep.subr.bf16.mxu1 %v14646_v7 }
 0x934   :  { %14302 = vmatmul.mubr.f32.vlgmr.msra.gmra.mrb[22].mxu1 %v12222_v41 }
 0x935   :  { %14649 = vmatpush3.bf16.msra.mxu1 %v14646_v7  ;;  %14320 = vmatprep.mubr.f32.mxu1 %v12210_v0 }
 0x936   :  { %14651 = vmatprep.subr.bf16.mxu1 %v14650_v17 }
 0x939   :  { %14653 = vmatpush3.bf16.msra.mxu1 %v14650_v17 }
 0x93a   :  { %14655 = vmatprep.subr.bf16.mxu1 %v14654_v29 }
 0x93d   :  { %14657 = vmatpush3.bf16.msra.mxu1 %v14654_v29 }
 0x93e   :  { %14659 = vmatprep.subr.bf16.mxu1 %v14658_v30 }
 0x941   :  { %14661 = vmatpush3.bf16.msra.mxu1 %v14658_v30 }
 0x942   :  { %14663 = vmatprep.subr.bf16.mxu1 %v16174_v8 }
 0x944   :  { %14321 = vmatmul.mubr.f32.vlgmr.msra.gmra.mrb[22].mxu1 %v12220_v60 }
 0x945   :  { %14665 = vmatpush3.bf16.msra.mxu1 %v16174_v8  ;;  %14339 = vmatprep.mubr.f32.mxu1 %v12210_v0  ;;  %v12785_v8 = vld [vmem:[%s16348_s6 + $0x28] sm:$0xff] }
 0x946   :  { %14667 = vmatprep.subr.bf16.mxu1 %v16180_v46 }
 0x949   :  { %14669 = vmatpush3.bf16.msra.mxu1 %v16180_v46 }
 0x94a   :  { %14671 = vmatprep.subr.bf16.mxu1 %v16261_v12 }
 0x94d   :  { %14673 = vmatpush3.bf16.msra.mxu1 %v16261_v12 }
 0x94e   :  { %14675 = vmatprep.subr.bf16.mxu1 %v16263_v49 }
 0x951   :  { %14677 = vmatpush3.bf16.msra.mxu1 %v16263_v49 }
 0x954   :  { %14340 = vmatmul.mubr.f32.vlgmr.msra.gmra.mrb[22].mxu1 %v12220_v60 }
 0x9ef   :  { %v14246_v9 = vpop.f32.mrb[24].mxu0 }
 0x9f0   :  { %v12216_v10 = vpop.f32.mrb[25].mxu0  ;;  %v12227_v46 = vadd.f32 %v14246_v9, %v12785_v8 }
 0x9f1   :  { %v12217_v15 = vadd.f32 %v12784_v11, %v12216_v10 }
 0xa27   :  { %v14341_v50 = vpop.f32.mrb[22].mxu1 }
 0xa28   :  { %v14691_v59 = vadd.f32 %v14341_v50, %v12227_v46  ;;  %v12707_v62 = vpop.f32.mrb[23].mxu1 }
 0xa29   :  { %v14693_v63 = vadd.f32 %v12707_v62, %v12217_v15 }
 0xa2a   :  { %v12718_v44 = vadd.f32 %v14691_v59, %v16204_v52 }
 0xa2b   :  { %v12717_v18 = vadd.f32 %v14693_v63, %v16206_v53 }
 0xa2c   :  { %v12722_v48 = vsel %vm87_vm0, %v12718_v44, 0.0 }
 0xa2d   :  { %12723 = vadd.xlane.f32.xlu0 %v12722_v48  ;;  %v12719_v19 = vsel %vm87_vm0, %v12717_v18, 0.0 }
 0xa2e   :  { %12720 = vadd.xlane.f32.xlu1 %v12719_v19 }
 0xaba   :  { %v12724_v20 = vpop.xlane.xlu0 %12723 }
 0xabb   :  { %v12726_v21 = vmul.f32 0.03125, %v12724_v20  ;;  %v12721_v45 = vpop.xlane.xlu1 %12720 }
 0xabc   :  { %v12725_v23 = vmul.f32 0.03125, %v12721_v45 }
 0xabd   :  { %v12728_v22 = vsub.f32 %v12718_v44, %v12726_v21 }
 0xabe   :  { %v12727_v13 = vsub.f32 %v12717_v18, %v12725_v23 }
 0xabf   :  { %v12730_v28 = vmul.f32 %v12728_v22, %v12728_v22 }
 0xac0   :  { %v12729_v14 = vmul.f32 %v12727_v13, %v12727_v13 }
 0xac1   :  { %v12734_v25 = vsel %vm87_vm0, %v12730_v28, 0.0 }
 0xac2   :  { %12735 = vadd.xlane.f32.xlu0 %v12734_v25  ;;  %v12731_v52 = vsel %vm87_vm0, %v12729_v14, 0.0 }
 0xac3   :  { %12732 = vadd.xlane.f32.xlu1 %v12731_v52 }
 0xb4f   :  { %v12736_v53 = vpop.xlane.xlu0 %12735 }
 0xb50   :  { %v12738_v33 = vmul.f32 0.03125, %v12736_v53  ;;  %v12733_v34 = vpop.xlane.xlu1 %12732 }
 0xb51   :  { %v12737_v35 = vmul.f32 0.03125, %v12733_v34 }
 0xb52   :  { %v12740_v37 = vadd.f32 1e-05, %v12738_v33 }
 0xb53   :  { %v12739_v31 = vadd.f32 1e-05, %v12737_v35 }
 0xb54   :  { %15004 = vrsqrt.f32 %v12740_v37  ;;  %vm12750_vm8 = vcmp.eq.f32.partialorder %v12740_v37, inf  ;;  %v12753_v43 = vand.u32 2147483648, %v12740_v37  ;;  %vm12752_vm9 = vcmp.eq.f32.partialorder %v12740_v37, 0.0 }
 0xb55   :  { %15006 = vrsqrt.f32 %v12739_v31  ;;  %vm12743_vm10 = vcmp.eq.f32.partialorder %v12739_v31, inf  ;;  %v12746_v49 = vand.u32 2147483648, %v12739_v31  ;;  %vm12745_vm11 = vcmp.eq.f32.partialorder %v12739_v31, 0.0 }
 0xb5e   :  { %v15005_v38 = vpop.eup %15004 }
 0xb5f   :  { %v15007_v39 = vpop.eup %15006  ;;  %v12749_v40 = vmul.f32 %v15005_v38, %v12740_v37 }
 0xb60   :  { %v12742_v24 = vmul.f32 %v15007_v39, %v12739_v31 }
 0xb61   :  { %v12751_v12 = vsel %vm12750_vm8, %v12740_v37, %v12749_v40 }
 0xb62   :  { %v12754_v51 = vsel %vm12752_vm9, %v12753_v43, %v12751_v12  ;;  %v12744_v54 = vsel %vm12743_vm10, %v12739_v31, %v12742_v24 }
 0xb63   :  { %15008 = vrcp.f32 %v12754_v51  ;;  %v12747_v29 = vsel %vm12745_vm11, %v12746_v49, %v12744_v54 }
 0xb64   :  { %15010 = vrcp.f32 %v12747_v29 }
 0xb6d   :  { %v15009_v30 = vpop.eup %15008 }
 0xb6e   :  { %v15011_v47 = vpop.eup %15010  ;;  %v12758_v42 = vmul.f32 %v15009_v30, %v12728_v22 }
 0xb6f   :  { %v12756_v56 = vmul.f32 %v15011_v47, %v12727_v13 }
 0xb70   :  { %v12760_v57 = vmul.f32 %v12791_v26, %v12758_v42 }
 0xb71   :  { %v12759_v58 = vmul.f32 %v12790_v32, %v12756_v56 }
 0xb72   :  { %v12762_v60 = vadd.f32 %v12793_v55, %v12760_v57 }
 0xb73   :  { %v12761_v61 = vadd.f32 %v12792_v16, %v12759_v58 }
 0xb74   :  { %12764 = vst.msk [vmem:[#allocation5 + $0x8] sm:$0xff] %vm87_vm0, %v12762_v60 }
 0xb75   :  { %12763 = vst.msk [vmem:[#allocation5] sm:$0xff] %vm87_vm0, %v12761_v61 }
 0xb76   :  { %15047 = shalt.err (!%p15044_p12)
}
 0xb77   :  { %s15048_s28 = scalar_lea.hbm %s16349_s7, 256 }
 0xb78   :  { %p15049_p13 = scmp.ne.s32.totalorder %s16349_s7, %s15048_s28  ;;  %p15052_p0 = scmp.lt.u32.totalorder %s15048_s28, %s16349_s7 }
 0xb7a   :  { %p15054_p1 = pnand %p15052_p0, %p15049_p13 }
 0xb7c   :  { %15057 = shalt.err (!%p15054_p1)
}
 0xb7d   :  { %12776 = dma.vmem_to_hbm [thread:$0]  %s12771_s26, 256, %s16349_s7, [#allocation4], %s15063_s11, %s15063_s11, %s15064_s12  }
 0xb7e   :  { %15060 = dma.done.wait [#allocation4], 256  }
 0xb7f   :  { %15061 = vsyncadd [#allocation4], 4294967040 }
 0xb80   :  { %12780 = vsyncpa [#allocation3], 1 }
 0xb81   :  { %12781 = vsyncpa [#allocation4], 1 }

</bundles_post_ra>
